<compile_context>
chip_gen: v6e
topology: v6e:2x2x1
jax: 0.10.0
libtpu: 0.0.40
codegen_flags: <defaults>
</compile_context>

<pallas_src>
import math

import numpy as np
import jax
import jax.numpy as jnp
from jax import lax
from jax.experimental import pallas as pl
from jax.experimental.pallas import tpu as pltpu


# ----------------------------------------------------------------------------
# wrapper glue (plain JAX): data rearrangement only, no hot compute
# ----------------------------------------------------------------------------
def _corner_patches_t(x_nhwc, K):
    """Transposed, pool-corner-grouped im2col.

    x (B, H, W, C) -> (B*4, K*K*C, P) with P = ((H-K+1)//2) * ((W-K+1)//2).
    Row-group b*4 + d (d = dh*2 + dw) holds, for every 2x2-pool output
    position q = ph*Wp + pw, the KxKxC patch of conv-output position
    (2*ph + dh, 2*pw + dw); the patch axis is ordered (kh, kw, c).
    A VALID conv + ReLU + 2x2/2 max-pool is then, per image b,
        max_d relu(W2d @ patches[b*4 + d] + bias)
    with W2d = conv weight transposed/reshaped to (Cout, K*K*C).
    """
    B, H, W, C = x_nhwc.shape
    Ho, Wo = H - K + 1, W - K + 1
    Hp, Wp = Ho // 2, Wo // 2
    corners = []
    for dh in (0, 1):
        for dw in (0, 1):
            cols = []
            for kh in range(K):
                for kw in range(K):
                    sl = lax.slice(
                        x_nhwc,
                        (0, dh + kh, dw + kw, 0),
                        (B, dh + kh + 2 * (Hp - 1) + 1,
                         dw + kw + 2 * (Wp - 1) + 1, C),
                        (1, 2, 2, 1))                    # (B, Hp, Wp, C)
                    cols.append(sl)
            p = jnp.stack(cols, axis=-2)                 # (B, Hp, Wp, K*K, C)
            p = p.reshape(B, Hp * Wp, K * K * C)         # (B, P, K*K*C)
            corners.append(jnp.transpose(p, (0, 2, 1)))  # (B, K*K*C, P)
    out = jnp.stack(corners, axis=1)                     # (B, 4, K*K*C, P)
    return out.reshape(B * 4, K * K * C, Hp * Wp)


# ----------------------------------------------------------------------------
# Pallas kernels
# ----------------------------------------------------------------------------
def _conv_relu_pool_kernel(p_ref, w_ref, b_ref, o_ref):
    # p_ref: (TB*4, D, P) bf16 | w_ref: (Cout, D) bf16 | b_ref: (Cout, 1) f32
    # o_ref: (TB, Cout, P) f32
    w = w_ref[...]
    b = b_ref[...]
    tb = o_ref.shape[0]
    for t in range(tb):
        pooled = None
        for d in range(4):
            # conv as transposed GEMM on the MXU: (Cout, D) @ (D, P)
            y = jnp.dot(w, p_ref[t * 4 + d],
                        preferred_element_type=jnp.float32)
            y = jnp.maximum(y + b, 0.0)                   # bias + ReLU (VPU)
            # 2x2 max-pool == elementwise max over the 4 corner GEMMs (VPU)
            pooled = y if pooled is None else jnp.maximum(pooled, y)
        o_ref[t] = pooled


def conv_relu_pool(patches, w_t, bias_col, cout, tb):
    B4, D, P = patches.shape
    B = B4 // 4
    return pl.pallas_call(
        _conv_relu_pool_kernel,
        grid=(B // tb,),
        in_specs=[
            pl.BlockSpec((tb * 4, D, P), lambda i: (i, 0, 0)),
            pl.BlockSpec((cout, D), lambda i: (0, 0)),     # weights resident
            pl.BlockSpec((cout, 1), lambda i: (0, 0)),     # bias resident
        ],
        out_specs=pl.BlockSpec((tb, cout, P), lambda i: (i, 0, 0)),
        out_shape=jax.ShapeDtypeStruct((B, cout, P), jnp.float32),
        compiler_params=pltpu.CompilerParams(
            dimension_semantics=("parallel",)),            # v7x: 2 TCs
    )(patches, w_t, bias_col)


def _mlp_kernel(x_ref, w1_ref, b1_ref, w2_ref, b2_ref, w3_ref, b3_ref, o_ref):
    h = jnp.dot(x_ref[...], w1_ref[...], preferred_element_type=jnp.float32)
    h = jnp.maximum(h + b1_ref[...], 0.0)
    h = jnp.dot(h.astype(jnp.bfloat16), w2_ref[...],
                preferred_element_type=jnp.float32)
    h = jnp.maximum(h + b2_ref[...], 0.0)
    o_ref[...] = (jnp.dot(h.astype(jnp.bfloat16), w3_ref[...],
                          preferred_element_type=jnp.float32) + b3_ref[...])


def mlp(x, w1, b1, w2, b2, w3, b3):
    B = x.shape[0]
    vm = pltpu.MemorySpace.VMEM
    return pl.pallas_call(
        _mlp_kernel,
        in_specs=[pl.BlockSpec(memory_space=vm)] * 7,
        out_specs=pl.BlockSpec(memory_space=vm),
        out_shape=jax.ShapeDtypeStruct((B, w3.shape[1]), jnp.float32),
    )(x, w1, b1, w2, b2, w3, b3)


# ----------------------------------------------------------------------------
# full forward (matches LeNet5Cifar10.forward)
# ----------------------------------------------------------------------------
def lenet5_forward(x_nchw, params):
    (w1, b1, w2, b2, fw1, fb1, fw2, fb2, fw3, fb3) = params
    B = x_nchw.shape[0]
    tb = math.gcd(B, 8)                      # batch tile per grid step
    bf16 = jnp.bfloat16

    # conv1 (3->6, 5x5) + ReLU + 2x2/2 max-pool
    x_nhwc = jnp.transpose(x_nchw, (0, 2, 3, 1))                  # (B,32,32,3)
    p1 = _corner_patches_t(x_nhwc, 5).astype(bf16)                # (B*4,75,196)
    w1t = jnp.transpose(w1, (0, 2, 3, 1)).reshape(6, 75).astype(bf16)
    a1 = conv_relu_pool(p1, w1t, b1.reshape(6, 1).astype(jnp.float32), 6, tb)
    # a1: (B, 6, 196) == NCHW (B, 6, 14, 14)

    # conv2 (6->16, 5x5) + ReLU + pool
    a1_nhwc = jnp.transpose(a1.reshape(B, 6, 14, 14), (0, 2, 3, 1))
    p2 = _corner_patches_t(a1_nhwc, 5).astype(bf16)               # (B*4,150,25)
    w2t = jnp.transpose(w2, (0, 2, 3, 1)).reshape(16, 150).astype(bf16)
    a2 = conv_relu_pool(p2, w2t, b2.reshape(16, 1).astype(jnp.float32), 16, tb)
    # a2: (B, 16, 25) — already PyTorch (C, H, W) flatten order
    flat = a2.reshape(B, 16 * 5 * 5).astype(bf16)

    # fc1 -> relu -> fc2 -> relu -> fc3 (hidden dims zero-padded to 128)
    fw1p = jnp.zeros((400, 128), jnp.float32).at[:, :120].set(fw1).astype(bf16)
    fb1p = jnp.zeros((1, 128), jnp.float32).at[:, :120].set(fb1)
    fw2p = jnp.zeros((128, 128), jnp.float32).at[:120, :84].set(fw2).astype(bf16)
    fb2p = jnp.zeros((1, 128), jnp.float32).at[:, :84].set(fb2)
    fw3p = jnp.zeros((128, 10), jnp.float32).at[:84, :].set(fw3).astype(bf16)
    fb3r = fb3.reshape(1, 10).astype(jnp.float32)
    return mlp(flat, fw1p, fb1p, fw2p, fb2p, fw3p, fb3r)


# ----------------------------------------------------------------------------
# deterministic parameter init (PyTorch-like uniform +-1/sqrt(fan_in))
# ----------------------------------------------------------------------------
def init_params(key):
    def u(k, shape, fan_in):
        bound = 1.0 / np.sqrt(fan_in)
        return jax.random.uniform(k, shape, jnp.float32, -bound, bound)

    ks = jax.random.split(key, 10)
    w1 = u(ks[0], (6, 3, 5, 5), 3 * 25);   b1 = u(ks[1], (6,), 3 * 25)
    w2 = u(ks[2], (16, 6, 5, 5), 6 * 25);  b2 = u(ks[3], (16,), 6 * 25)
    fw1 = u(ks[4], (400, 120), 400);       fb1 = u(ks[5], (120,), 400)
    fw2 = u(ks[6], (120, 84), 120);        fb2 = u(ks[7], (84,), 120)
    fw3 = u(ks[8], (84, 10), 84);          fb3 = u(ks[9], (10,), 84)
    return (w1, b1, w2, b2, fw1, fb1, fw2, fb2, fw3, fb3)


# ----------------------------------------------------------------------------
# pure-JAX f32 reference (mirrors the PyTorch module exactly)
# ----------------------------------------------------------------------------
def reference_forward(x, params):
    (w1, b1, w2, b2, fw1, fb1, fw2, fb2, fw3, fb3) = params
    dn = ('NCHW', 'OIHW', 'NCHW')

    def pool(y):
        return lax.reduce_window(y, -jnp.inf, lax.max,
                                 (1, 1, 2, 2), (1, 1, 2, 2), 'VALID')

    y = lax.conv_general_dilated(x, w1, (1, 1), 'VALID', dimension_numbers=dn)
    y = pool(jnp.maximum(y + b1[None, :, None, None], 0.0))
    y = lax.conv_general_dilated(y, w2, (1, 1), 'VALID', dimension_numbers=dn)
    y = pool(jnp.maximum(y + b2[None, :, None, None], 0.0))
    f = y.reshape(y.shape[0], -1)            # NCHW flatten == torch .view
    h = jnp.maximum(f @ fw1 + fb1, 0.0)
    h = jnp.maximum(h @ fw2 + fb2, 0.0)
    return h @ fw3 + fb3


if __name__ == "__main__":
    key = jax.random.PRNGKey(0)
    kx, kp = jax.random.split(key)
    # CIFAR-sized input is required by the architecture (fc1 expects 16*5*5).
    x = jax.random.normal(kx, (2, 3, 32, 32), jnp.float32)
    params = init_params(kp)

    forward = jax.jit(lenet5_forward)
    out = jax.block_until_ready(forward(x, params))
    assert out.shape == (2, 10), out.shape

    ref = jax.block_until_ready(reference_forward(x, params))
    # bf16 MXU inputs with f32 accumulation -> slightly looser tolerance than
    # the pure-f32 v1 (errors observed are a few 1e-3 on O(0.1) logits).
    np.testing.assert_allclose(np.asarray(out), np.asarray(ref),
                               rtol=2e-2, atol=2e-2)
    print("KERNEL_OK")
</pallas_src>

<mosaic_0001>
module attributes {stable_mosaic.version = 11 : i64} {
  func.func @_conv_relu_pool_kernel(%arg0: i32, %arg1: memref<8x75x196xbf16, #tpu.memory_space<vmem>>, %arg2: memref<6x75xbf16, #tpu.memory_space<vmem>>, %arg3: memref<6x1xf32, #tpu.memory_space<vmem>>, %arg4: memref<2x6x196xf32, #tpu.memory_space<vmem>>) attributes {dimension_semantics = [#tpu.dimension_semantics<parallel>], iteration_bounds = array<i64: 1>, scalar_prefetch = 0 : i64, scratch_operands = 0 : i64, tpu.core_type = #tpu.core_type<tc>, window_params = [{transform_indices = @transform_0, window_bounds = array<i64: 8, 75, 196>}, {pipeline_mode = #tpu.pipeline_mode<synchronous>, transform_indices = @transform_1, window_bounds = array<i64: 6, 75>}, {pipeline_mode = #tpu.pipeline_mode<synchronous>, transform_indices = @transform_2, window_bounds = array<i64: 6, 1>}, {transform_indices = @transform_3, window_bounds = array<i64: 2, 6, 196>}]} {
    %c0 = arith.constant 0 : index
    %c0_0 = arith.constant 0 : index
    %0 = vector.load %arg2[%c0, %c0_0] : memref<6x75xbf16, #tpu.memory_space<vmem>>, vector<6x75xbf16>
    %c0_1 = arith.constant 0 : index
    %c0_2 = arith.constant 0 : index
    %1 = vector.load %arg3[%c0_1, %c0_2] : memref<6x1xf32, #tpu.memory_space<vmem>>, vector<6x1xf32>
    %c0_3 = arith.constant 0 : index
    %c0_4 = arith.constant 0 : index
    %c0_5 = arith.constant 0 : index
    %2 = vector.load %arg1[%c0_3, %c0_4, %c0_5] : memref<8x75x196xbf16, #tpu.memory_space<vmem>>, vector<1x75x196xbf16>
    %3 = vector.shape_cast %2 : vector<1x75x196xbf16> to vector<75x196xbf16>
    %cst = arith.constant dense<0.000000e+00> : vector<6x196xf32>
    %4 = tpu.matmul %0, %3, %cst {dimension_numbers = #tpu.dot_dimension_numbers<[1], [0], [0], [1], [0, 0, 1, 1], [], []>} : vector<6x75xbf16>, vector<75x196xbf16>, vector<6x196xf32> -> vector<6x196xf32>
    %5 = vector.broadcast %1 : vector<6x1xf32> to vector<6x196xf32>
    %6 = arith.addf %4, %5 : vector<6x196xf32>
    %cst_6 = arith.constant 0.000000e+00 : f32
    %7 = vector.broadcast %cst_6 : f32 to vector<6x196xf32>
    %8 = arith.maximumf %6, %7 : vector<6x196xf32>
    %c1 = arith.constant 1 : index
    %c0_7 = arith.constant 0 : index
    %c0_8 = arith.constant 0 : index
    %9 = vector.load %arg1[%c1, %c0_7, %c0_8] : memref<8x75x196xbf16, #tpu.memory_space<vmem>>, vector<1x75x196xbf16>
    %10 = vector.shape_cast %9 : vector<1x75x196xbf16> to vector<75x196xbf16>
    %cst_9 = arith.constant dense<0.000000e+00> : vector<6x196xf32>
    %11 = tpu.matmul %0, %10, %cst_9 {dimension_numbers = #tpu.dot_dimension_numbers<[1], [0], [0], [1], [0, 0, 1, 1], [], []>} : vector<6x75xbf16>, vector<75x196xbf16>, vector<6x196xf32> -> vector<6x196xf32>
    %12 = vector.broadcast %1 : vector<6x1xf32> to vector<6x196xf32>
    %13 = arith.addf %11, %12 : vector<6x196xf32>
    %cst_10 = arith.constant 0.000000e+00 : f32
    %14 = vector.broadcast %cst_10 : f32 to vector<6x196xf32>
    %15 = arith.maximumf %13, %14 : vector<6x196xf32>
    %16 = arith.maximumf %8, %15 : vector<6x196xf32>
    %c2 = arith.constant 2 : index
    %c0_11 = arith.constant 0 : index
    %c0_12 = arith.constant 0 : index
    %17 = vector.load %arg1[%c2, %c0_11, %c0_12] : memref<8x75x196xbf16, #tpu.memory_space<vmem>>, vector<1x75x196xbf16>
    %18 = vector.shape_cast %17 : vector<1x75x196xbf16> to vector<75x196xbf16>
    %cst_13 = arith.constant dense<0.000000e+00> : vector<6x196xf32>
    %19 = tpu.matmul %0, %18, %cst_13 {dimension_numbers = #tpu.dot_dimension_numbers<[1], [0], [0], [1], [0, 0, 1, 1], [], []>} : vector<6x75xbf16>, vector<75x196xbf16>, vector<6x196xf32> -> vector<6x196xf32>
    %20 = vector.broadcast %1 : vector<6x1xf32> to vector<6x196xf32>
    %21 = arith.addf %19, %20 : vector<6x196xf32>
    %cst_14 = arith.constant 0.000000e+00 : f32
    %22 = vector.broadcast %cst_14 : f32 to vector<6x196xf32>
    %23 = arith.maximumf %21, %22 : vector<6x196xf32>
    %24 = arith.maximumf %16, %23 : vector<6x196xf32>
    %c3 = arith.constant 3 : index
    %c0_15 = arith.constant 0 : index
    %c0_16 = arith.constant 0 : index
    %25 = vector.load %arg1[%c3, %c0_15, %c0_16] : memref<8x75x196xbf16, #tpu.memory_space<vmem>>, vector<1x75x196xbf16>
    %26 = vector.shape_cast %25 : vector<1x75x196xbf16> to vector<75x196xbf16>
    %cst_17 = arith.constant dense<0.000000e+00> : vector<6x196xf32>
    %27 = tpu.matmul %0, %26, %cst_17 {dimension_numbers = #tpu.dot_dimension_numbers<[1], [0], [0], [1], [0, 0, 1, 1], [], []>} : vector<6x75xbf16>, vector<75x196xbf16>, vector<6x196xf32> -> vector<6x196xf32>
    %28 = vector.broadcast %1 : vector<6x1xf32> to vector<6x196xf32>
    %29 = arith.addf %27, %28 : vector<6x196xf32>
    %cst_18 = arith.constant 0.000000e+00 : f32
    %30 = vector.broadcast %cst_18 : f32 to vector<6x196xf32>
    %31 = arith.maximumf %29, %30 : vector<6x196xf32>
    %32 = arith.maximumf %24, %31 : vector<6x196xf32>
    %c0_19 = arith.constant 0 : index
    %c0_20 = arith.constant 0 : index
    %c0_21 = arith.constant 0 : index
    %33 = vector.load %arg4[%c0_19, %c0_20, %c0_21] : memref<2x6x196xf32, #tpu.memory_space<vmem>>, vector<1x6x196xf32>
    %34 = vector.shape_cast %33 : vector<1x6x196xf32> to vector<6x196xf32>
    %35 = vector.shape_cast %32 : vector<6x196xf32> to vector<1x6x196xf32>
    tpu.vector_store %arg4[%c0_19, %c0_20, %c0_21], %35 {strides = array<i32>} : memref<2x6x196xf32, #tpu.memory_space<vmem>>, vector<1x6x196xf32>,
    %c4 = arith.constant 4 : index
    %c0_22 = arith.constant 0 : index
    %c0_23 = arith.constant 0 : index
    %36 = vector.load %arg1[%c4, %c0_22, %c0_23] : memref<8x75x196xbf16, #tpu.memory_space<vmem>>, vector<1x75x196xbf16>
    %37 = vector.shape_cast %36 : vector<1x75x196xbf16> to vector<75x196xbf16>
    %cst_24 = arith.constant dense<0.000000e+00> : vector<6x196xf32>
    %38 = tpu.matmul %0, %37, %cst_24 {dimension_numbers = #tpu.dot_dimension_numbers<[1], [0], [0], [1], [0, 0, 1, 1], [], []>} : vector<6x75xbf16>, vector<75x196xbf16>, vector<6x196xf32> -> vector<6x196xf32>
    %39 = vector.broadcast %1 : vector<6x1xf32> to vector<6x196xf32>
    %40 = arith.addf %38, %39 : vector<6x196xf32>
    %cst_25 = arith.constant 0.000000e+00 : f32
    %41 = vector.broadcast %cst_25 : f32 to vector<6x196xf32>
    %42 = arith.maximumf %40, %41 : vector<6x196xf32>
    %c5 = arith.constant 5 : index
    %c0_26 = arith.constant 0 : index
    %c0_27 = arith.constant 0 : index
    %43 = vector.load %arg1[%c5, %c0_26, %c0_27] : memref<8x75x196xbf16, #tpu.memory_space<vmem>>, vector<1x75x196xbf16>
    %44 = vector.shape_cast %43 : vector<1x75x196xbf16> to vector<75x196xbf16>
    %cst_28 = arith.constant dense<0.000000e+00> : vector<6x196xf32>
    %45 = tpu.matmul %0, %44, %cst_28 {dimension_numbers = #tpu.dot_dimension_numbers<[1], [0], [0], [1], [0, 0, 1, 1], [], []>} : vector<6x75xbf16>, vector<75x196xbf16>, vector<6x196xf32> -> vector<6x196xf32>
    %46 = vector.broadcast %1 : vector<6x1xf32> to vector<6x196xf32>
    %47 = arith.addf %45, %46 : vector<6x196xf32>
    %cst_29 = arith.constant 0.000000e+00 : f32
    %48 = vector.broadcast %cst_29 : f32 to vector<6x196xf32>
    %49 = arith.maximumf %47, %48 : vector<6x196xf32>
    %50 = arith.maximumf %42, %49 : vector<6x196xf32>
    %c6 = arith.constant 6 : index
    %c0_30 = arith.constant 0 : index
    %c0_31 = arith.constant 0 : index
    %51 = vector.load %arg1[%c6, %c0_30, %c0_31] : memref<8x75x196xbf16, #tpu.memory_space<vmem>>, vector<1x75x196xbf16>
    %52 = vector.shape_cast %51 : vector<1x75x196xbf16> to vector<75x196xbf16>
    %cst_32 = arith.constant dense<0.000000e+00> : vector<6x196xf32>
    %53 = tpu.matmul %0, %52, %cst_32 {dimension_numbers = #tpu.dot_dimension_numbers<[1], [0], [0], [1], [0, 0, 1, 1], [], []>} : vector<6x75xbf16>, vector<75x196xbf16>, vector<6x196xf32> -> vector<6x196xf32>
    %54 = vector.broadcast %1 : vector<6x1xf32> to vector<6x196xf32>
    %55 = arith.addf %53, %54 : vector<6x196xf32>
    %cst_33 = arith.constant 0.000000e+00 : f32
    %56 = vector.broadcast %cst_33 : f32 to vector<6x196xf32>
    %57 = arith.maximumf %55, %56 : vector<6x196xf32>
    %58 = arith.maximumf %50, %57 : vector<6x196xf32>
    %c7 = arith.constant 7 : index
    %c0_34 = arith.constant 0 : index
    %c0_35 = arith.constant 0 : index
    %59 = vector.load %arg1[%c7, %c0_34, %c0_35] : memref<8x75x196xbf16, #tpu.memory_space<vmem>>, vector<1x75x196xbf16>
    %60 = vector.shape_cast %59 : vector<1x75x196xbf16> to vector<75x196xbf16>
    %cst_36 = arith.constant dense<0.000000e+00> : vector<6x196xf32>
    %61 = tpu.matmul %0, %60, %cst_36 {dimension_numbers = #tpu.dot_dimension_numbers<[1], [0], [0], [1], [0, 0, 1, 1], [], []>} : vector<6x75xbf16>, vector<75x196xbf16>, vector<6x196xf32> -> vector<6x196xf32>
    %62 = vector.broadcast %1 : vector<6x1xf32> to vector<6x196xf32>
    %63 = arith.addf %61, %62 : vector<6x196xf32>
    %cst_37 = arith.constant 0.000000e+00 : f32
    %64 = vector.broadcast %cst_37 : f32 to vector<6x196xf32>
    %65 = arith.maximumf %63, %64 : vector<6x196xf32>
    %66 = arith.maximumf %58, %65 : vector<6x196xf32>
    %c1_38 = arith.constant 1 : index
    %c0_39 = arith.constant 0 : index
    %c0_40 = arith.constant 0 : index
    %67 = vector.load %arg4[%c1_38, %c0_39, %c0_40] : memref<2x6x196xf32, #tpu.memory_space<vmem>>, vector<1x6x196xf32>
    %68 = vector.shape_cast %67 : vector<1x6x196xf32> to vector<6x196xf32>
    %69 = vector.shape_cast %66 : vector<6x196xf32> to vector<1x6x196xf32>
    tpu.vector_store %arg4[%c1_38, %c0_39, %c0_40], %69 {strides = array<i32>} : memref<2x6x196xf32, #tpu.memory_space<vmem>>, vector<1x6x196xf32>,
    return
  }
  func.func @transform_0(%arg0: i32) -> (i32, i32, i32) {
    %c0_i32 = arith.constant 0 : i32
    %c0_i32_0 = arith.constant 0 : i32
    %c0_i32_1 = arith.constant 0 : i32
    return %arg0, %c0_i32, %c0_i32_0 : i32, i32, i32
  }
  func.func @transform_1(%arg0: i32) -> (i32, i32) {
    %c0_i32 = arith.constant 0 : i32
    %c0_i32_0 = arith.constant 0 : i32
    %c0_i32_1 = arith.constant 0 : i32
    return %c0_i32, %c0_i32_0 : i32, i32
  }
  func.func @transform_2(%arg0: i32) -> (i32, i32) {
    %c0_i32 = arith.constant 0 : i32
    %c0_i32_0 = arith.constant 0 : i32
    %c0_i32_1 = arith.constant 0 : i32
    return %c0_i32, %c0_i32_0 : i32, i32
  }
  func.func @transform_3(%arg0: i32) -> (i32, i32, i32) {
    %c0_i32 = arith.constant 0 : i32
    %c0_i32_0 = arith.constant 0 : i32
    %c0_i32_1 = arith.constant 0 : i32
    return %arg0, %c0_i32, %c0_i32_0 : i32, i32, i32
  }
}

module attributes {stable_mosaic.version = 11 : i64} {
  func.func @_conv_relu_pool_kernel(%arg0: i32, %arg1: memref<8x150x25xbf16, #tpu.memory_space<vmem>>, %arg2: memref<16x150xbf16, #tpu.memory_space<vmem>>, %arg3: memref<16x1xf32, #tpu.memory_space<vmem>>, %arg4: memref<2x16x25xf32, #tpu.memory_space<vmem>>) attributes {dimension_semantics = [#tpu.dimension_semantics<parallel>], iteration_bounds = array<i64: 1>, scalar_prefetch = 0 : i64, scratch_operands = 0 : i64, tpu.core_type = #tpu.core_type<tc>, window_params = [{transform_indices = @transform_0, window_bounds = array<i64: 8, 150, 25>}, {pipeline_mode = #tpu.pipeline_mode<synchronous>, transform_indices = @transform_1, window_bounds = array<i64: 16, 150>}, {pipeline_mode = #tpu.pipeline_mode<synchronous>, transform_indices = @transform_2, window_bounds = array<i64: 16, 1>}, {transform_indices = @transform_3, window_bounds = array<i64: 2, 16, 25>}]} {
    %c0 = arith.constant 0 : index
    %c0_0 = arith.constant 0 : index
    %0 = vector.load %arg2[%c0, %c0_0] : memref<16x150xbf16, #tpu.memory_space<vmem>>, vector<16x150xbf16>
    %c0_1 = arith.constant 0 : index
    %c0_2 = arith.constant 0 : index
    %1 = vector.load %arg3[%c0_1, %c0_2] : memref<16x1xf32, #tpu.memory_space<vmem>>, vector<16x1xf32>
    %c0_3 = arith.constant 0 : index
    %c0_4 = arith.constant 0 : index
    %c0_5 = arith.constant 0 : index
    %2 = vector.load %arg1[%c0_3, %c0_4, %c0_5] : memref<8x150x25xbf16, #tpu.memory_space<vmem>>, vector<1x150x25xbf16>
    %3 = vector.shape_cast %2 : vector<1x150x25xbf16> to vector<150x25xbf16>
    %cst = arith.constant dense<0.000000e+00> : vector<16x25xf32>
    %4 = tpu.matmul %0, %3, %cst {dimension_numbers = #tpu.dot_dimension_numbers<[1], [0], [0], [1], [0, 0, 1, 1], [], []>} : vector<16x150xbf16>, vector<150x25xbf16>, vector<16x25xf32> -> vector<16x25xf32>
    %5 = vector.broadcast %1 : vector<16x1xf32> to vector<16x25xf32>
    %6 = arith.addf %4, %5 : vector<16x25xf32>
    %cst_6 = arith.constant 0.000000e+00 : f32
    %7 = vector.broadcast %cst_6 : f32 to vector<16x25xf32>
    %8 = arith.maximumf %6, %7 : vector<16x25xf32>
    %c1 = arith.constant 1 : index
    %c0_7 = arith.constant 0 : index
    %c0_8 = arith.constant 0 : index
    %9 = vector.load %arg1[%c1, %c0_7, %c0_8] : memref<8x150x25xbf16, #tpu.memory_space<vmem>>, vector<1x150x25xbf16>
    %10 = vector.shape_cast %9 : vector<1x150x25xbf16> to vector<150x25xbf16>
    %cst_9 = arith.constant dense<0.000000e+00> : vector<16x25xf32>
    %11 = tpu.matmul %0, %10, %cst_9 {dimension_numbers = #tpu.dot_dimension_numbers<[1], [0], [0], [1], [0, 0, 1, 1], [], []>} : vector<16x150xbf16>, vector<150x25xbf16>, vector<16x25xf32> -> vector<16x25xf32>
    %12 = vector.broadcast %1 : vector<16x1xf32> to vector<16x25xf32>
    %13 = arith.addf %11, %12 : vector<16x25xf32>
    %cst_10 = arith.constant 0.000000e+00 : f32
    %14 = vector.broadcast %cst_10 : f32 to vector<16x25xf32>
    %15 = arith.maximumf %13, %14 : vector<16x25xf32>
    %16 = arith.maximumf %8, %15 : vector<16x25xf32>
    %c2 = arith.constant 2 : index
    %c0_11 = arith.constant 0 : index
    %c0_12 = arith.constant 0 : index
    %17 = vector.load %arg1[%c2, %c0_11, %c0_12] : memref<8x150x25xbf16, #tpu.memory_space<vmem>>, vector<1x150x25xbf16>
    %18 = vector.shape_cast %17 : vector<1x150x25xbf16> to vector<150x25xbf16>
    %cst_13 = arith.constant dense<0.000000e+00> : vector<16x25xf32>
    %19 = tpu.matmul %0, %18, %cst_13 {dimension_numbers = #tpu.dot_dimension_numbers<[1], [0], [0], [1], [0, 0, 1, 1], [], []>} : vector<16x150xbf16>, vector<150x25xbf16>, vector<16x25xf32> -> vector<16x25xf32>
    %20 = vector.broadcast %1 : vector<16x1xf32> to vector<16x25xf32>
    %21 = arith.addf %19, %20 : vector<16x25xf32>
    %cst_14 = arith.constant 0.000000e+00 : f32
    %22 = vector.broadcast %cst_14 : f32 to vector<16x25xf32>
    %23 = arith.maximumf %21, %22 : vector<16x25xf32>
    %24 = arith.maximumf %16, %23 : vector<16x25xf32>
    %c3 = arith.constant 3 : index
    %c0_15 = arith.constant 0 : index
    %c0_16 = arith.constant 0 : index
    %25 = vector.load %arg1[%c3, %c0_15, %c0_16] : memref<8x150x25xbf16, #tpu.memory_space<vmem>>, vector<1x150x25xbf16>
    %26 = vector.shape_cast %25 : vector<1x150x25xbf16> to vector<150x25xbf16>
    %cst_17 = arith.constant dense<0.000000e+00> : vector<16x25xf32>
    %27 = tpu.matmul %0, %26, %cst_17 {dimension_numbers = #tpu.dot_dimension_numbers<[1], [0], [0], [1], [0, 0, 1, 1], [], []>} : vector<16x150xbf16>, vector<150x25xbf16>, vector<16x25xf32> -> vector<16x25xf32>
    %28 = vector.broadcast %1 : vector<16x1xf32> to vector<16x25xf32>
    %29 = arith.addf %27, %28 : vector<16x25xf32>
    %cst_18 = arith.constant 0.000000e+00 : f32
    %30 = vector.broadcast %cst_18 : f32 to vector<16x25xf32>
    %31 = arith.maximumf %29, %30 : vector<16x25xf32>
    %32 = arith.maximumf %24, %31 : vector<16x25xf32>
    %c0_19 = arith.constant 0 : index
    %c0_20 = arith.constant 0 : index
    %c0_21 = arith.constant 0 : index
    %33 = vector.load %arg4[%c0_19, %c0_20, %c0_21] : memref<2x16x25xf32, #tpu.memory_space<vmem>>, vector<1x16x25xf32>
    %34 = vector.shape_cast %33 : vector<1x16x25xf32> to vector<16x25xf32>
    %35 = vector.shape_cast %32 : vector<16x25xf32> to vector<1x16x25xf32>
    tpu.vector_store %arg4[%c0_19, %c0_20, %c0_21], %35 {strides = array<i32>} : memref<2x16x25xf32, #tpu.memory_space<vmem>>, vector<1x16x25xf32>,
    %c4 = arith.constant 4 : index
    %c0_22 = arith.constant 0 : index
    %c0_23 = arith.constant 0 : index
    %36 = vector.load %arg1[%c4, %c0_22, %c0_23] : memref<8x150x25xbf16, #tpu.memory_space<vmem>>, vector<1x150x25xbf16>
    %37 = vector.shape_cast %36 : vector<1x150x25xbf16> to vector<150x25xbf16>
    %cst_24 = arith.constant dense<0.000000e+00> : vector<16x25xf32>
    %38 = tpu.matmul %0, %37, %cst_24 {dimension_numbers = #tpu.dot_dimension_numbers<[1], [0], [0], [1], [0, 0, 1, 1], [], []>} : vector<16x150xbf16>, vector<150x25xbf16>, vector<16x25xf32> -> vector<16x25xf32>
    %39 = vector.broadcast %1 : vector<16x1xf32> to vector<16x25xf32>
    %40 = arith.addf %38, %39 : vector<16x25xf32>
    %cst_25 = arith.constant 0.000000e+00 : f32
    %41 = vector.broadcast %cst_25 : f32 to vector<16x25xf32>
    %42 = arith.maximumf %40, %41 : vector<16x25xf32>
    %c5 = arith.constant 5 : index
    %c0_26 = arith.constant 0 : index
    %c0_27 = arith.constant 0 : index
    %43 = vector.load %arg1[%c5, %c0_26, %c0_27] : memref<8x150x25xbf16, #tpu.memory_space<vmem>>, vector<1x150x25xbf16>
    %44 = vector.shape_cast %43 : vector<1x150x25xbf16> to vector<150x25xbf16>
    %cst_28 = arith.constant dense<0.000000e+00> : vector<16x25xf32>
    %45 = tpu.matmul %0, %44, %cst_28 {dimension_numbers = #tpu.dot_dimension_numbers<[1], [0], [0], [1], [0, 0, 1, 1], [], []>} : vector<16x150xbf16>, vector<150x25xbf16>, vector<16x25xf32> -> vector<16x25xf32>
    %46 = vector.broadcast %1 : vector<16x1xf32> to vector<16x25xf32>
    %47 = arith.addf %45, %46 : vector<16x25xf32>
    %cst_29 = arith.constant 0.000000e+00 : f32
    %48 = vector.broadcast %cst_29 : f32 to vector<16x25xf32>
    %49 = arith.maximumf %47, %48 : vector<16x25xf32>
    %50 = arith.maximumf %42, %49 : vector<16x25xf32>
    %c6 = arith.constant 6 : index
    %c0_30 = arith.constant 0 : index
    %c0_31 = arith.constant 0 : index
    %51 = vector.load %arg1[%c6, %c0_30, %c0_31] : memref<8x150x25xbf16, #tpu.memory_space<vmem>>, vector<1x150x25xbf16>
    %52 = vector.shape_cast %51 : vector<1x150x25xbf16> to vector<150x25xbf16>
    %cst_32 = arith.constant dense<0.000000e+00> : vector<16x25xf32>
    %53 = tpu.matmul %0, %52, %cst_32 {dimension_numbers = #tpu.dot_dimension_numbers<[1], [0], [0], [1], [0, 0, 1, 1], [], []>} : vector<16x150xbf16>, vector<150x25xbf16>, vector<16x25xf32> -> vector<16x25xf32>
    %54 = vector.broadcast %1 : vector<16x1xf32> to vector<16x25xf32>
    %55 = arith.addf %53, %54 : vector<16x25xf32>
    %cst_33 = arith.constant 0.000000e+00 : f32
    %56 = vector.broadcast %cst_33 : f32 to vector<16x25xf32>
    %57 = arith.maximumf %55, %56 : vector<16x25xf32>
    %58 = arith.maximumf %50, %57 : vector<16x25xf32>
    %c7 = arith.constant 7 : index
    %c0_34 = arith.constant 0 : index
    %c0_35 = arith.constant 0 : index
    %59 = vector.load %arg1[%c7, %c0_34, %c0_35] : memref<8x150x25xbf16, #tpu.memory_space<vmem>>, vector<1x150x25xbf16>
    %60 = vector.shape_cast %59 : vector<1x150x25xbf16> to vector<150x25xbf16>
    %cst_36 = arith.constant dense<0.000000e+00> : vector<16x25xf32>
    %61 = tpu.matmul %0, %60, %cst_36 {dimension_numbers = #tpu.dot_dimension_numbers<[1], [0], [0], [1], [0, 0, 1, 1], [], []>} : vector<16x150xbf16>, vector<150x25xbf16>, vector<16x25xf32> -> vector<16x25xf32>
    %62 = vector.broadcast %1 : vector<16x1xf32> to vector<16x25xf32>
    %63 = arith.addf %61, %62 : vector<16x25xf32>
    %cst_37 = arith.constant 0.000000e+00 : f32
    %64 = vector.broadcast %cst_37 : f32 to vector<16x25xf32>
    %65 = arith.maximumf %63, %64 : vector<16x25xf32>
    %66 = arith.maximumf %58, %65 : vector<16x25xf32>
    %c1_38 = arith.constant 1 : index
    %c0_39 = arith.constant 0 : index
    %c0_40 = arith.constant 0 : index
    %67 = vector.load %arg4[%c1_38, %c0_39, %c0_40] : memref<2x16x25xf32, #tpu.memory_space<vmem>>, vector<1x16x25xf32>
    %68 = vector.shape_cast %67 : vector<1x16x25xf32> to vector<16x25xf32>
    %69 = vector.shape_cast %66 : vector<16x25xf32> to vector<1x16x25xf32>
    tpu.vector_store %arg4[%c1_38, %c0_39, %c0_40], %69 {strides = array<i32>} : memref<2x16x25xf32, #tpu.memory_space<vmem>>, vector<1x16x25xf32>,
    return
  }
  func.func @transform_0(%arg0: i32) -> (i32, i32, i32) {
    %c0_i32 = arith.constant 0 : i32
    %c0_i32_0 = arith.constant 0 : i32
    %c0_i32_1 = arith.constant 0 : i32
    return %arg0, %c0_i32, %c0_i32_0 : i32, i32, i32
  }
  func.func @transform_1(%arg0: i32) -> (i32, i32) {
    %c0_i32 = arith.constant 0 : i32
    %c0_i32_0 = arith.constant 0 : i32
    %c0_i32_1 = arith.constant 0 : i32
    return %c0_i32, %c0_i32_0 : i32, i32
  }
  func.func @transform_2(%arg0: i32) -> (i32, i32) {
    %c0_i32 = arith.constant 0 : i32
    %c0_i32_0 = arith.constant 0 : i32
    %c0_i32_1 = arith.constant 0 : i32
    return %c0_i32, %c0_i32_0 : i32, i32
  }
  func.func @transform_3(%arg0: i32) -> (i32, i32, i32) {
    %c0_i32 = arith.constant 0 : i32
    %c0_i32_0 = arith.constant 0 : i32
    %c0_i32_1 = arith.constant 0 : i32
    return %arg0, %c0_i32, %c0_i32_0 : i32, i32, i32
  }
}

module attributes {stable_mosaic.version = 11 : i64} {
  func.func @_mlp_kernel(%arg0: memref<2x400xbf16, #tpu.memory_space<vmem>>, %arg1: memref<400x128xbf16, #tpu.memory_space<vmem>>, %arg2: memref<1x128xf32, #tpu.memory_space<vmem>>, %arg3: memref<128x128xbf16, #tpu.memory_space<vmem>>, %arg4: memref<1x128xf32, #tpu.memory_space<vmem>>, %arg5: memref<128x10xbf16, #tpu.memory_space<vmem>>, %arg6: memref<1x10xf32, #tpu.memory_space<vmem>>, %arg7: memref<2x10xf32, #tpu.memory_space<vmem>>) attributes {dimension_semantics = [], scalar_prefetch = 0 : i64, scratch_operands = 0 : i64, tpu.core_type = #tpu.core_type<tc>} {
    %c0 = arith.constant 0 : index
    %c0_0 = arith.constant 0 : index
    %0 = vector.load %arg0[%c0, %c0_0] : memref<2x400xbf16, #tpu.memory_space<vmem>>, vector<2x400xbf16>
    %c0_1 = arith.constant 0 : index
    %c0_2 = arith.constant 0 : index
    %1 = vector.load %arg1[%c0_1, %c0_2] : memref<400x128xbf16, #tpu.memory_space<vmem>>, vector<400x128xbf16>
    %cst = arith.constant dense<0.000000e+00> : vector<2x128xf32>
    %2 = tpu.matmul %0, %1, %cst {dimension_numbers = #tpu.dot_dimension_numbers<[1], [0], [0], [1], [0, 0, 1, 1], [], []>} : vector<2x400xbf16>, vector<400x128xbf16>, vector<2x128xf32> -> vector<2x128xf32>
    %c0_3 = arith.constant 0 : index
    %c0_4 = arith.constant 0 : index
    %3 = vector.load %arg2[%c0_3, %c0_4] : memref<1x128xf32, #tpu.memory_space<vmem>>, vector<1x128xf32>
    %4 = vector.broadcast %3 : vector<1x128xf32> to vector<2x128xf32>
    %5 = arith.addf %2, %4 : vector<2x128xf32>
    %cst_5 = arith.constant 0.000000e+00 : f32
    %6 = vector.broadcast %cst_5 : f32 to vector<2x128xf32>
    %7 = arith.maximumf %5, %6 : vector<2x128xf32>
    %8 = arith.truncf %7 : vector<2x128xf32> to vector<2x128xbf16>
    %c0_6 = arith.constant 0 : index
    %c0_7 = arith.constant 0 : index
    %9 = vector.load %arg3[%c0_6, %c0_7] : memref<128x128xbf16, #tpu.memory_space<vmem>>, vector<128x128xbf16>
    %cst_8 = arith.constant dense<0.000000e+00> : vector<2x128xf32>
    %10 = tpu.matmul %8, %9, %cst_8 {dimension_numbers = #tpu.dot_dimension_numbers<[1], [0], [0], [1], [0, 0, 1, 1], [], []>} : vector<2x128xbf16>, vector<128x128xbf16>, vector<2x128xf32> -> vector<2x128xf32>
    %c0_9 = arith.constant 0 : index
    %c0_10 = arith.constant 0 : index
    %11 = vector.load %arg4[%c0_9, %c0_10] : memref<1x128xf32, #tpu.memory_space<vmem>>, vector<1x128xf32>
    %12 = vector.broadcast %11 : vector<1x128xf32> to vector<2x128xf32>
    %13 = arith.addf %10, %12 : vector<2x128xf32>
    %cst_11 = arith.constant 0.000000e+00 : f32
    %14 = vector.broadcast %cst_11 : f32 to vector<2x128xf32>
    %15 = arith.maximumf %13, %14 : vector<2x128xf32>
    %16 = arith.truncf %15 : vector<2x128xf32> to vector<2x128xbf16>
    %c0_12 = arith.constant 0 : index
    %c0_13 = arith.constant 0 : index
    %17 = vector.load %arg5[%c0_12, %c0_13] : memref<128x10xbf16, #tpu.memory_space<vmem>>, vector<128x10xbf16>
    %cst_14 = arith.constant dense<0.000000e+00> : vector<2x10xf32>
    %18 = tpu.matmul %16, %17, %cst_14 {dimension_numbers = #tpu.dot_dimension_numbers<[1], [0], [0], [1], [0, 0, 1, 1], [], []>} : vector<2x128xbf16>, vector<128x10xbf16>, vector<2x10xf32> -> vector<2x10xf32>
    %c0_15 = arith.constant 0 : index
    %c0_16 = arith.constant 0 : index
    %19 = vector.load %arg6[%c0_15, %c0_16] : memref<1x10xf32, #tpu.memory_space<vmem>>, vector<1x10xf32>
    %20 = vector.broadcast %19 : vector<1x10xf32> to vector<2x10xf32>
    %21 = arith.addf %18, %20 : vector<2x10xf32>
    %c0_17 = arith.constant 0 : index
    %c0_18 = arith.constant 0 : index
    %22 = vector.load %arg7[%c0_17, %c0_18] : memref<2x10xf32, #tpu.memory_space<vmem>>, vector<2x10xf32>
    tpu.vector_store %arg7[%c0_17, %c0_18], %21 {strides = array<i32>} : memref<2x10xf32, #tpu.memory_space<vmem>>, vector<2x10xf32>,
    return
  }
}

</mosaic_0001>

<bundles_post_ra>
// kernel: lenet5_forward.3
= control target key start
LH: loop header
LB: loop body
LE: loop exit
PB: predicated region body
PF: predicated region fallthrough
CT: control target
= control target key end

     0   :  { %vm84_vm0 = vcmask 1044480   ;;  %vm85_vm1 = vcmask 1045504   ;;  %v1198_v1 = vmov 0   ;;  %v1199_v2 = vmov 65535   ;;  %s1525_s0 = inlined_call_operand.vmem [shape: bf16[8,75,196], index: 0, kind: input, shape index: {}]   ;;  %s1526_s1 = inlined_call_operand.vmem [shape: bf16[6,75], index: 1, kind: input, shape index: {}]   ;;  %s1527_s2 = inlined_call_operand.vmem [shape: f32[6,1], index: 2, kind: input, shape index: {}]   ;;  %s1528_s3 = inlined_call_operand.vmem [shape: f32[2,6,196], index: 3, kind: output, shape index: {}]  }
   0x1   :  { %v1078_v0 = vld [vmem:[%s1525_s0 + $0x44] ss:$8 sps:$4 sm:$0x3f]   ;;  %126 = vmatprep.mubr.bf16.mxu0 %v1198_v1  ;;  %234 = vmatprep.mubr.bf16.mxu1 %v1198_v1  ;;  %v86_v3 = vsel %vm84_vm0, 4294967295, %v1199_v2  ;;  %v1084_v10 = vld [vmem:[%s1525_s0 + $0x34] ss:$8 sps:$4 sm:$0xff]  }
   0x2   :  { %1077 = vset.pattern.permute.xlu0 %v1198_v1  ;;  %v1226_v4 = vsel %vm85_vm1, %v86_v3, 0  ;;  %v1080_v5 = vld [vmem:[%s1525_s0 + $0x94] ss:$8 sps:$4 sm:$0x3f]   ;;  %v1086_v11 = vld [vmem:[%s1525_s0 + $0x84] ss:$8 sps:$4 sm:$0xff]  }
   0x3   :  { %v92_v6 = vand.u32 %v1078_v0, %v1226_v4  ;;  %v1082_v7 = vld [vmem:[%s1525_s0 + $0x40] ss:$8 sps:$4 sm:$0x3f]   ;;  %v1083_v8 = vld [vmem:[%s1525_s0 + $0x90] ss:$8 sps:$4 sm:$0x3f]   ;;  %v200_v9 = vand.u32 %v1080_v5, %v1226_v4 }
   0x4   :  { %v89_v12 = vand.u32 %v1082_v7, %v1226_v4  ;;  %v197_v13 = vand.u32 %v1083_v8, %v1226_v4  ;;  %v1088_v14 = vld [vmem:[%s1525_s0 + $0x30] ss:$8 sps:$4 sm:$0xff]   ;;  %v1089_v15 = vld [vmem:[%s1525_s0 + $0x80] ss:$8 sps:$4 sm:$0xff]   ;;  %v1090_v16 = vld [vmem:[%s1525_s0 + $0x24] ss:$8 sps:$4 sm:$0xff]  }
   0x5   :  { %100 = vmatprep.subr.bf16.mxu0 %v92_v6  ;;  %208 = vmatprep.subr.bf16.mxu1 %v200_v9  ;;  %v1092_v17 = vld [vmem:[%s1525_s0 + $0x74] ss:$8 sps:$4 sm:$0xff]   ;;  %v1094_v18 = vld [vmem:[%s1525_s0 + $0x20] ss:$8 sps:$4 sm:$0xff]   ;;  %v1095_v19 = vld [vmem:[%s1525_s0 + $0x70] ss:$8 sps:$4 sm:$0xff]  }
   0x6   :  { %101 = vmatpush1.bf16.msra.mxu0 %v89_v12  ;;  %209 = vmatpush1.bf16.msra.mxu1 %v197_v13  ;;  %v1096_v20 = vld [vmem:[%s1525_s0 + $0x14] ss:$8 sps:$4 sm:$0xff]   ;;  %v1098_v21 = vld [vmem:[%s1525_s0 + $0x64] ss:$8 sps:$4 sm:$0xff]   ;;  %v1100_v22 = vld [vmem:[%s1525_s0 + $0x10] ss:$8 sps:$4 sm:$0xff]  }
   0x7   :  { %102 = vmatprep.subr.bf16.mxu0 %v1084_v10  ;;  %210 = vmatprep.subr.bf16.mxu1 %v1086_v11  ;;  %v1101_v23 = vld [vmem:[%s1525_s0 + $0x60] ss:$8 sps:$4 sm:$0xff]   ;;  %v1102_v24 = vld [vmem:[%s1525_s0 + $0x4] ss:$8 sps:$4 sm:$0xff]   ;;  %v1104_v25 = vld [vmem:[%s1525_s0 + $0x54] ss:$8 sps:$4 sm:$0xff]  }
   0x8   :  { %v1110_v26 = vld [vmem:[%s1525_s0 + $0xe4] ss:$8 sps:$4 sm:$0x3f]   ;;  %v1113_v27 = vld [vmem:[%s1525_s0 + $0x134] ss:$8 sps:$4 sm:$0x3f]  }
   0x9   :  { %v1106_v28 = vld [vmem:[%s1525_s0] ss:$8 sps:$4 sm:$0xff]   ;;  %v1107_v30 = vld [vmem:[%s1525_s0 + $0x50] ss:$8 sps:$4 sm:$0xff]   ;;  %v310_v32 = vand.u32 %v1110_v26, %v1226_v4  ;;  %v420_v33 = vand.u32 %v1113_v27, %v1226_v4  ;;  %vm80_vm2 = vcmask 613376   ;;  %vm468_vm3 = vcmask 553984  }
   0xa   :  { %103 = vmatpush1.bf16.msra.mxu0 %v1088_v14  ;;  %211 = vmatpush1.bf16.msra.mxu1 %v1089_v15  ;;  %v1108_v29 = vld [vmem:[%s1525_s0 + $0xe0] ss:$8 sps:$4 sm:$0x3f]   ;;  %v1111_v31 = vld [vmem:[%s1525_s0 + $0x130] ss:$8 sps:$4 sm:$0x3f]  }
   0xb   :  { %104 = vmatprep.subr.bf16.mxu0 %v1090_v16  ;;  %212 = vmatprep.subr.bf16.mxu1 %v1092_v17  ;;  %v1306_v34 = vld [vmem:[%s1526_s1] sm:$0x7]  ;;  %v307_v35 = vand.u32 %v1108_v29, %v1226_v4  ;;  %v417_v36 = vand.u32 %v1111_v31, %v1226_v4  ;;  %v1116_v37 = vld [vmem:[%s1525_s0 + $0xd4] ss:$8 sps:$4 sm:$0xff]   ;;  %v1119_v38 = vld [vmem:[%s1525_s0 + $0x124] ss:$8 sps:$4 sm:$0xff]  }
   0xc   :  { %v1114_v39 = vld [vmem:[%s1525_s0 + $0xd0] ss:$8 sps:$4 sm:$0xff]   ;;  %v1117_v40 = vld [vmem:[%s1525_s0 + $0x120] ss:$8 sps:$4 sm:$0xff]   ;;  %v1122_v41 = vld [vmem:[%s1525_s0 + $0xc4] ss:$8 sps:$4 sm:$0xff]  }
   0xd   :  { %v1125_v42 = vld [vmem:[%s1525_s0 + $0x114] ss:$8 sps:$4 sm:$0xff]   ;;  %v1120_v43 = vld [vmem:[%s1525_s0 + $0xc0] ss:$8 sps:$4 sm:$0xff]   ;;  %v1123_v44 = vld [vmem:[%s1525_s0 + $0x110] ss:$8 sps:$4 sm:$0xff]  }
   0xe   :  { %105 = vmatpush1.bf16.msra.mxu0 %v1094_v18  ;;  %213 = vmatpush1.bf16.msra.mxu1 %v1095_v19  ;;  %v1128_v45 = vld [vmem:[%s1525_s0 + $0xb4] ss:$8 sps:$4 sm:$0xff]   ;;  %v1131_v46 = vld [vmem:[%s1525_s0 + $0x104] ss:$8 sps:$4 sm:$0xff]   ;;  %v1126_v47 = vld [vmem:[%s1525_s0 + $0xb0] ss:$8 sps:$4 sm:$0xff]  }
   0xf   :  { %106 = vmatprep.subr.bf16.mxu0 %v1096_v20  ;;  %214 = vmatprep.subr.bf16.mxu1 %v1098_v21  ;;  %v1129_v48 = vld [vmem:[%s1525_s0 + $0x100] ss:$8 sps:$4 sm:$0xff]   ;;  %v1134_v49 = vld [vmem:[%s1525_s0 + $0xa4] ss:$8 sps:$4 sm:$0xff]   ;;  %v1137_v50 = vld [vmem:[%s1525_s0 + $0xf4] ss:$8 sps:$4 sm:$0xff]  }
  0x10   :  { %v1140_v51 = vld [vmem:[%s1525_s0 + $0x184] ss:$8 sps:$4 sm:$0x3f]   ;;  %v1143_v52 = vld [vmem:[%s1525_s0 + $0x1d4] ss:$8 sps:$4 sm:$0x3f]  }
  0x11   :  { %v1132_v53 = vld [vmem:[%s1525_s0 + $0xa0] ss:$8 sps:$4 sm:$0xff]   ;;  %v1135_v55 = vld [vmem:[%s1525_s0 + $0xf0] ss:$8 sps:$4 sm:$0xff]   ;;  %v533_v57 = vand.u32 %v1140_v51, %v1226_v4  ;;  %v641_v58 = vand.u32 %v1143_v52, %v1226_v4  ;;  %v1146_v61 = vld [vmem:[%s1525_s0 + $0x174] ss:$8 sps:$4 sm:$0xff]  }
  0x12   :  { %107 = vmatpush1.bf16.msra.mxu0 %v1100_v22  ;;  %215 = vmatpush1.bf16.msra.mxu1 %v1101_v23  ;;  %v1138_v54 = vld [vmem:[%s1525_s0 + $0x180] ss:$8 sps:$4 sm:$0x3f]   ;;  %v1141_v56 = vld [vmem:[%s1525_s0 + $0x1d0] ss:$8 sps:$4 sm:$0x3f]  }
  0x13   :  { %108 = vmatprep.subr.bf16.mxu0 %v1102_v24  ;;  %216 = vmatprep.subr.bf16.mxu1 %v1104_v25  ;;  %v530_v59 = vand.u32 %v1138_v54, %v1226_v4  ;;  %v638_v60 = vand.u32 %v1141_v56, %v1226_v4  ;;  %v1149_v62 = vld [vmem:[%s1525_s0 + $0x1c4] ss:$8 sps:$4 sm:$0xff]   ;;  %v1144_v63 = vld [vmem:[%s1525_s0 + $0x170] ss:$8 sps:$4 sm:$0xff]   ;;  %v1147_v0 = vld [vmem:[%s1525_s0 + $0x1c0] ss:$8 sps:$4 sm:$0xff]  }
  0x14   :  { %v1152_v2 = vld [vmem:[%s1525_s0 + $0x164] ss:$8 sps:$4 sm:$0xff]   ;;  %v1155_v3 = vld [vmem:[%s1525_s0 + $0x1b4] ss:$8 sps:$4 sm:$0xff]   ;;  %v1150_v5 = vld [vmem:[%s1525_s0 + $0x160] ss:$8 sps:$4 sm:$0xff]  }
  0x15   :  { %v1153_v6 = vld [vmem:[%s1525_s0 + $0x1b0] ss:$8 sps:$4 sm:$0xff]   ;;  %v1158_v7 = vld [vmem:[%s1525_s0 + $0x154] ss:$8 sps:$4 sm:$0xff]   ;;  %v1161_v8 = vld [vmem:[%s1525_s0 + $0x1a4] ss:$8 sps:$4 sm:$0xff]  }
  0x16   :  { %109 = vmatpush1.bf16.msra.mxu0 %v1106_v28  ;;  %217 = vmatpush1.bf16.msra.mxu1 %v1107_v30  ;;  %v1156_v9 = vld [vmem:[%s1525_s0 + $0x150] ss:$8 sps:$4 sm:$0xff]   ;;  %v1159_v10 = vld [vmem:[%s1525_s0 + $0x1a0] ss:$8 sps:$4 sm:$0xff]   ;;  %v1164_v11 = vld [vmem:[%s1525_s0 + $0x144] ss:$8 sps:$4 sm:$0xff]  }
  0x17   :  { %318 = vmatprep.subr.bf16.mxu0 %v310_v32  ;;  %428 = vmatprep.subr.bf16.mxu1 %v420_v33  ;;  %v1167_v12 = vld [vmem:[%s1525_s0 + $0x194] ss:$8 sps:$4 sm:$0xff]   ;;  %v16_v13 = vld [vmem:[%s1527_s2] sm:$0x3f]  ;;  %v1165_v17 = vld [vmem:[%s1525_s0 + $0x190] ss:$8 sps:$4 sm:$0xff]  }
  0x18   :  { %v1170_v14 = vld [vmem:[%s1525_s0 + $0x224] ss:$8 sps:$4 sm:$0x3f]   ;;  %v1173_v15 = vld [vmem:[%s1525_s0 + $0x274] ss:$8 sps:$4 sm:$0x3f]   ;;  %29 = vperm.xlu0 %1077, %v16_v13  }
  0x19   :  { %925 = vmatmul.mubr.msk.bf16.vlgmr.msra.gmra.mxu0 %vm80_vm2, %v1306_v34  ;;  %946 = vmatmul.mubr.msk.bf16.vlgmr.msra.gmra.mxu1 %vm80_vm2, %v1306_v34  ;;  %v1162_v16 = vld [vmem:[%s1525_s0 + $0x140] ss:$8 sps:$4 sm:$0xff]   ;;  %v1171_v19 = vld [vmem:[%s1525_s0 + $0x270] ss:$8 sps:$4 sm:$0x3f]   ;;  %v751_v20 = vand.u32 %v1170_v14, %v1226_v4  ;;  %v861_v21 = vand.u32 %v1173_v15, %v1226_v4 }
  0x1a   :  { %319 = vmatpush1.bf16.msra.mxu0 %v307_v35  ;;  %429 = vmatpush1.bf16.msra.mxu1 %v417_v36  ;;  %v1168_v18 = vld [vmem:[%s1525_s0 + $0x220] ss:$8 sps:$4 sm:$0x3f]   ;;  %v858_v23 = vand.u32 %v1171_v19, %v1226_v4  ;;  %v1176_v24 = vld [vmem:[%s1525_s0 + $0x214] ss:$8 sps:$4 sm:$0xff]  }
  0x1b   :  { %320 = vmatprep.subr.bf16.mxu0 %v1116_v37  ;;  %430 = vmatprep.subr.bf16.mxu1 %v1119_v38  ;;  %v748_v22 = vand.u32 %v1168_v18, %v1226_v4  ;;  %v1179_v25 = vld [vmem:[%s1525_s0 + $0x264] ss:$8 sps:$4 sm:$0xff]   ;;  %v1174_v4 = vld [vmem:[%s1525_s0 + $0x210] ss:$8 sps:$4 sm:$0xff]   ;;  %v1177_v26 = vld [vmem:[%s1525_s0 + $0x260] ss:$8 sps:$4 sm:$0xff]  }
  0x1c   :  { %344 = vmatprep.mubr.bf16.mxu0 %v1198_v1  ;;  %454 = vmatprep.mubr.bf16.mxu1 %v1198_v1  ;;  %v1182_v27 = vld [vmem:[%s1525_s0 + $0x204] ss:$8 sps:$4 sm:$0xff]   ;;  %v1185_v28 = vld [vmem:[%s1525_s0 + $0x254] ss:$8 sps:$4 sm:$0xff]   ;;  %v1180_v29 = vld [vmem:[%s1525_s0 + $0x200] ss:$8 sps:$4 sm:$0xff]  }
  0x1d   :  { %v1183_v30 = vld [vmem:[%s1525_s0 + $0x250] ss:$8 sps:$4 sm:$0xff]   ;;  %v1188_v31 = vld [vmem:[%s1525_s0 + $0x1f4] ss:$8 sps:$4 sm:$0xff]   ;;  %v1189_v33 = vld [vmem:[%s1525_s0 + $0x240] ss:$8 sps:$4 sm:$0xff]  }
  0x1e   :  { %321 = vmatpush1.bf16.msra.mxu0 %v1114_v39  ;;  %431 = vmatpush1.bf16.msra.mxu1 %v1117_v40  ;;  %v1186_v32 = vld [vmem:[%s1525_s0 + $0x1f0] ss:$8 sps:$4 sm:$0xff]   ;;  %v1194_v35 = vld [vmem:[%s1525_s0 + $0x1e4] ss:$8 sps:$4 sm:$0xff]   ;;  %v1197_v36 = vld [vmem:[%s1525_s0 + $0x234] ss:$8 sps:$4 sm:$0xff]  }
  0x1f   :  { %322 = vmatprep.subr.bf16.mxu0 %v1122_v41  ;;  %432 = vmatprep.subr.bf16.mxu1 %v1125_v42  ;;  %v1192_v37 = vld [vmem:[%s1525_s0 + $0x1e0] ss:$8 sps:$4 sm:$0xff]   ;;  %v1195_v38 = vld [vmem:[%s1525_s0 + $0x230] ss:$8 sps:$4 sm:$0xff]  }
  0x22   :  { %323 = vmatpush1.bf16.msra.mxu0 %v1120_v43  ;;  %433 = vmatpush1.bf16.msra.mxu1 %v1123_v44 }
  0x23   :  { %324 = vmatprep.subr.bf16.mxu0 %v1128_v45  ;;  %434 = vmatprep.subr.bf16.mxu1 %v1131_v46 }
  0x26   :  { %325 = vmatpush1.bf16.msra.mxu0 %v1126_v47  ;;  %435 = vmatpush1.bf16.msra.mxu1 %v1129_v48 }
  0x27   :  { %326 = vmatprep.subr.bf16.mxu0 %v1134_v49  ;;  %436 = vmatprep.subr.bf16.mxu1 %v1137_v50 }
  0x2a   :  { %327 = vmatpush1.bf16.msra.mxu0 %v1132_v53  ;;  %437 = vmatpush1.bf16.msra.mxu1 %v1135_v55 }
  0x2b   :  { %541 = vmatprep.subr.bf16.mxu0 %v533_v57  ;;  %649 = vmatprep.subr.bf16.mxu1 %v641_v58 }
  0x2d   :  { %967 = vmatmul.mubr.msk.bf16.vlgmr.msra.gmra.mxu0 %vm80_vm2, %v1306_v34  ;;  %988 = vmatmul.mubr.msk.bf16.vlgmr.msra.gmra.mxu1 %vm80_vm2, %v1306_v34 }
  0x2e   :  { %542 = vmatpush1.bf16.msra.mxu0 %v530_v59  ;;  %650 = vmatpush1.bf16.msra.mxu1 %v638_v60 }
  0x2f   :  { %543 = vmatprep.subr.bf16.mxu0 %v1146_v61  ;;  %651 = vmatprep.subr.bf16.mxu1 %v1149_v62 }
  0x30   :  { %567 = vmatprep.mubr.bf16.mxu0 %v1198_v1  ;;  %675 = vmatprep.mubr.bf16.mxu1 %v1198_v1 }
  0x32   :  { %544 = vmatpush1.bf16.msra.mxu0 %v1144_v63  ;;  %652 = vmatpush1.bf16.msra.mxu1 %v1147_v0 }
  0x33   :  { %545 = vmatprep.subr.bf16.mxu0 %v1152_v2  ;;  %653 = vmatprep.subr.bf16.mxu1 %v1155_v3 }
  0x36   :  { %546 = vmatpush1.bf16.msra.mxu0 %v1150_v5  ;;  %654 = vmatpush1.bf16.msra.mxu1 %v1153_v6 }
  0x37   :  { %547 = vmatprep.subr.bf16.mxu0 %v1158_v7  ;;  %655 = vmatprep.subr.bf16.mxu1 %v1161_v8 }
  0x3a   :  { %548 = vmatpush1.bf16.msra.mxu0 %v1156_v9  ;;  %656 = vmatpush1.bf16.msra.mxu1 %v1159_v10 }
  0x3b   :  { %549 = vmatprep.subr.bf16.mxu0 %v1164_v11  ;;  %657 = vmatprep.subr.bf16.mxu1 %v1167_v12 }
  0x3e   :  { %550 = vmatpush1.bf16.msra.mxu0 %v1162_v16  ;;  %658 = vmatpush1.bf16.msra.mxu1 %v1165_v17 }
  0x3f   :  { %759 = vmatprep.subr.bf16.mxu0 %v751_v20  ;;  %869 = vmatprep.subr.bf16.mxu1 %v861_v21 }
  0x41   :  { %1009 = vmatmul.mubr.msk.bf16.vlgmr.msra.gmra.mxu0 %vm80_vm2, %v1306_v34  ;;  %1030 = vmatmul.mubr.msk.bf16.vlgmr.msra.gmra.mxu1 %vm80_vm2, %v1306_v34 }
  0x42   :  { %760 = vmatpush1.bf16.msra.mxu0 %v748_v22  ;;  %870 = vmatpush1.bf16.msra.mxu1 %v858_v23 }
  0x43   :  { %761 = vmatprep.subr.bf16.mxu0 %v1176_v24  ;;  %871 = vmatprep.subr.bf16.mxu1 %v1179_v25 }
  0x44   :  { %785 = vmatprep.mubr.bf16.mxu0 %v1198_v1  ;;  %895 = vmatprep.mubr.bf16.mxu1 %v1198_v1  ;;  %v1191_v1 = vld [vmem:[%s1525_s0 + $0x244] ss:$8 sps:$4 sm:$0xff]  }
  0x46   :  { %762 = vmatpush1.bf16.msra.mxu0 %v1174_v4  ;;  %872 = vmatpush1.bf16.msra.mxu1 %v1177_v26 }
  0x47   :  { %763 = vmatprep.subr.bf16.mxu0 %v1182_v27  ;;  %873 = vmatprep.subr.bf16.mxu1 %v1185_v28 }
  0x4a   :  { %764 = vmatpush1.bf16.msra.mxu0 %v1180_v29  ;;  %874 = vmatpush1.bf16.msra.mxu1 %v1183_v30 }
  0x4b   :  { %765 = vmatprep.subr.bf16.mxu0 %v1188_v31  ;;  %875 = vmatprep.subr.bf16.mxu1 %v1191_v1 }
  0x4e   :  { %766 = vmatpush1.bf16.msra.mxu0 %v1186_v32  ;;  %876 = vmatpush1.bf16.msra.mxu1 %v1189_v33 }
  0x4f   :  { %767 = vmatprep.subr.bf16.mxu0 %v1194_v35  ;;  %877 = vmatprep.subr.bf16.mxu1 %v1197_v36 }
  0x52   :  { %768 = vmatpush1.bf16.msra.mxu0 %v1192_v37  ;;  %878 = vmatpush1.bf16.msra.mxu1 %v1195_v38 }
  0x55   :  { %1051 = vmatmul.mubr.msk.bf16.vlgmr.msra.gmra.mxu0 %vm80_vm2, %v1306_v34  ;;  %1072 = vmatmul.mubr.msk.bf16.vlgmr.msra.gmra.mxu1 %vm80_vm2, %v1306_v34 }
  0x93   :  { %v30_v47 = vpop.permute.xlu0 %29 }
  0xd9   :  { %v128_v39 = vpop.f32.mrf.mxu0  ;;  %v236_v40 = vpop.f32.mrf.mxu1 }
  0xda   :  { %v129_v48 = vadd.f32 %v128_v39, %v30_v47  ;;  %v237_v49 = vadd.f32 %v236_v40, %v30_v47 }
  0xdb   :  { %v130_v41 = vpop.f32.mrf.mxu0  ;;  %v238_v42 = vpop.f32.mrf.mxu1 }
  0xdc   :  { %v131_v50 = vadd.f32 %v130_v41, %v30_v47  ;;  %v239_v51 = vadd.f32 %v238_v42, %v30_v47  ;;  %v135_v52 = vmax.f32 %v129_v48, 0.0  ;;  %v243_v53 = vmax.f32 %v237_v49, 0.0 }
  0xdd   :  { %v132_v43 = vpop.f32.mrf.mxu0  ;;  %v240_v44 = vpop.f32.mrf.mxu1 }
  0xde   :  { %v136_v56 = vmax.f32 %v131_v50, 0.0  ;;  %v244_v57 = vmax.f32 %v239_v51, 0.0  ;;  %v245_v59 = vmax.f32 %v135_v52, %v243_v53 }
  0xdf   :  { %v133_v45 = vpop.f32.mrf.mxu0  ;;  %v241_v46 = vpop.f32.mrf.mxu1 }
  0xe0   :  { %v246_v6 = vmax.f32 %v136_v56, %v244_v57 }
  0xed   :  { %v346_v54 = vpop.f32.mrf.mxu0  ;;  %v456_v55 = vpop.f32.mrf.mxu1 }
  0xee   :  { %v347_v34 = vadd.f32 %v346_v54, %v30_v47  ;;  %v457_v58 = vadd.f32 %v456_v55, %v30_v47 }
  0xef   :  { %v348_v60 = vpop.f32.mrf.mxu0  ;;  %v458_v61 = vpop.f32.mrf.mxu1 }
  0xf0   :  { %v353_v62 = vmax.f32 %v347_v34, 0.0  ;;  %v463_v63 = vmax.f32 %v457_v58, 0.0  ;;  %v349_v0 = vadd.f32 %v348_v60, %v30_v47  ;;  %v459_v2 = vadd.f32 %v458_v61, %v30_v47 }
  0xf1   :  { %v350_v3 = vpop.f32.mrf.mxu0  ;;  %v460_v5 = vpop.f32.mrf.mxu1 }
  0xf2   :  { %v355_v7 = vmax.f32 %v245_v59, %v353_v62  ;;  %v354_v8 = vmax.f32 %v349_v0, 0.0  ;;  %v464_v9 = vmax.f32 %v459_v2, 0.0 }
  0xf3   :  { %v351_v10 = vpop.f32.mrf.mxu0  ;;  %v461_v11 = vpop.f32.mrf.mxu1 }
  0xf4   :  { %v465_v12 = vmax.f32 %v355_v7, %v463_v63  ;;  %v356_v13 = vmax.f32 %v246_v6, %v354_v8 }
  0xf6   :  { %467 = vst [vmem:[%s1528_s3] sm:$0x3f] %v465_v12  ;;  %v466_v14 = vmax.f32 %v356_v13, %v464_v9 }
  0xf8   :  { %469 = vst.msk [vmem:[%s1528_s3 + $0x8] sm:$0x3f] %vm468_vm3, %v466_v14 }
 0x101   :  { %v569_v15 = vpop.f32.mrf.mxu0  ;;  %v677_v16 = vpop.f32.mrf.mxu1 }
 0x102   :  { %v570_v23 = vadd.f32 %v569_v15, %v30_v47  ;;  %v678_v24 = vadd.f32 %v677_v16, %v30_v47 }
 0x103   :  { %v571_v17 = vpop.f32.mrf.mxu0  ;;  %v679_v18 = vpop.f32.mrf.mxu1 }
 0x104   :  { %v572_v25 = vadd.f32 %v571_v17, %v30_v47  ;;  %v680_v4 = vadd.f32 %v679_v18, %v30_v47  ;;  %v576_v26 = vmax.f32 %v570_v23, 0.0  ;;  %v684_v27 = vmax.f32 %v678_v24, 0.0 }
 0x105   :  { %v573_v19 = vpop.f32.mrf.mxu0  ;;  %v681_v20 = vpop.f32.mrf.mxu1 }
 0x106   :  { %v577_v30 = vmax.f32 %v572_v25, 0.0  ;;  %v685_v31 = vmax.f32 %v680_v4, 0.0  ;;  %v686_v36 = vmax.f32 %v576_v26, %v684_v27 }
 0x107   :  { %v574_v21 = vpop.f32.mrf.mxu0  ;;  %v682_v22 = vpop.f32.mrf.mxu1 }
 0x108   :  { %v687_v42 = vmax.f32 %v577_v30, %v685_v31 }
 0x115   :  { %v787_v28 = vpop.f32.mrf.mxu0  ;;  %v897_v29 = vpop.f32.mrf.mxu1 }
 0x116   :  { %v788_v1 = vadd.f32 %v787_v28, %v30_v47  ;;  %v898_v32 = vadd.f32 %v897_v29, %v30_v47 }
 0x117   :  { %v789_v33 = vpop.f32.mrf.mxu0  ;;  %v899_v35 = vpop.f32.mrf.mxu1 }
 0x118   :  { %v794_v37 = vmax.f32 %v788_v1, 0.0  ;;  %v790_v38 = vadd.f32 %v789_v33, %v30_v47  ;;  %v900_v39 = vadd.f32 %v899_v35, %v30_v47  ;;  %v904_v44 = vmax.f32 %v898_v32, 0.0 }
 0x119   :  { %v791_v40 = vpop.f32.mrf.mxu0  ;;  %v901_v41 = vpop.f32.mrf.mxu1 }
 0x11a   :  { %v796_v43 = vmax.f32 %v686_v36, %v794_v37  ;;  %v795_v45 = vmax.f32 %v790_v38, 0.0  ;;  %v905_v51 = vmax.f32 %v900_v39, 0.0 }
 0x11b   :  { %v792_v46 = vpop.f32.mrf.mxu0  ;;  %v902_v48 = vpop.f32.mrf.mxu1 }
 0x11c   :  { %v906_v49 = vmax.f32 %v796_v43, %v904_v44  ;;  %v797_v50 = vmax.f32 %v687_v42, %v795_v45 }
 0x11e   :  { %1073 = vst [vmem:[%s1528_s3 + $0x10] sm:$0x3f] %v906_v49  ;;  %v907_v52 = vmax.f32 %v797_v50, %v905_v51 }
 0x120   :  { %1074 = vst.msk [vmem:[%s1528_s3 + $0x18] sm:$0x3f] %vm468_vm3, %v907_v52 }

// kernel: lenet5_forward.4
= control target key start
LH: loop header
LB: loop body
LE: loop exit
PB: predicated region body
PF: predicated region fallthrough
CT: control target
= control target key end

     0   :  { %v1358_v0 = vmov 0   ;;  %vm114_vm0 = vcmask 179200   ;;  %vm118_vm1 = vcmask 1042432   ;;  %vm540_vm2 = vcmask 203776   ;;  %s1764_s0 = inlined_call_operand.vmem [shape: bf16[8,150,25], index: 0, kind: input, shape index: {}]   ;;  %s1765_s1 = inlined_call_operand.vmem [shape: bf16[16,150], index: 1, kind: input, shape index: {}]   ;;  %s1766_s2 = inlined_call_operand.vmem [shape: f32[16,1], index: 2, kind: input, shape index: {}]   ;;  %s1767_s3 = inlined_call_operand.vmem [shape: f32[2,16,25], index: 3, kind: output, shape index: {}]  }
   0x1   :  { %122 = vmatprep.subr.bf16.mxu0 %v1358_v0  ;;  %245 = vmatprep.subr.bf16.mxu1 %v1358_v0  ;;  %v1275_v1 = vld [vmem:[%s1764_s0 + $0x38] sm:$0xff]   ;;  %v1276_v2 = vld [vmem:[%s1764_s0 + $0x84] sm:$0xff]   ;;  %v1277_v3 = vld [vmem:[%s1764_s0 + $0x30] sm:$0xff]  }
   0x2   :  { %1274 = vset.pattern.permute.xlu0 %v1358_v0  ;;  %123 = vmatpush1.bf16.msra.mxu0 %v1275_v1  ;;  %v1278_v4 = vld [vmem:[%s1764_s0 + $0x7c] sm:$0xff]   ;;  %v1279_v5 = vld [vmem:[%s1764_s0 + $0x28] sm:$0xff]   ;;  %v1280_v6 = vld [vmem:[%s1764_s0 + $0x74] sm:$0xff]  }
   0x3   :  { %246 = vmatpush1.bf16.msra.mxu1 %v1276_v2  ;;  %124 = vmatprep.subr.bf16.mxu0 %v1358_v0  ;;  %v1281_v7 = vld [vmem:[%s1764_s0 + $0x20] sm:$0xff]   ;;  %v1282_v8 = vld [vmem:[%s1764_s0 + $0x6c] sm:$0xff]   ;;  %v1283_v9 = vld [vmem:[%s1764_s0 + $0x18] sm:$0xff]  }
   0x4   :  { %247 = vmatprep.subr.bf16.mxu1 %v1358_v0  ;;  %v1284_v10 = vld [vmem:[%s1764_s0 + $0x64] sm:$0xff]   ;;  %v1285_v11 = vld [vmem:[%s1764_s0 + $0x10] sm:$0xff]   ;;  %v1286_v12 = vld [vmem:[%s1764_s0 + $0x5c] sm:$0xff]  }
   0x5   :  { %v1431_v13 = vld [vmem:[%s1765_s1 + $0x4] ss:$8 sps:$4 sm:$0xff]   ;;  %v1288_v15 = vld [vmem:[%s1764_s0 + $0x54] sm:$0xff]   ;;  %v1291_v16 = vld [vmem:[%s1764_s0 + $0x48] ss:$0 sps:$4 sm:$0x77]  }
   0x6   :  { %125 = vmatpush1.bf16.msra.mxu0 %v1277_v3  ;;  %v1287_v14 = vld [vmem:[%s1764_s0 + $0x8] sm:$0xff]   ;;  %1060 = vmatprep.mubr.msk.bf16.mxu0 %vm114_vm0, %v1431_v13  ;;  %v1289_v17 = vld [vmem:[%s1764_s0] sm:$0xff]   ;;  %v1292_v18 = vld [vmem:[%s1764_s0 + $0x94] ss:$0 sps:$4 sm:$0x77]   ;;  %v120_v20 = vsel %vm118_vm1, %v1291_v16, 0 }
   0x7   :  { %248 = vmatpush1.bf16.msra.mxu1 %v1278_v4  ;;  %126 = vmatprep.subr.bf16.mxu0 %v1358_v0  ;;  %v1290_v19 = vld [vmem:[%s1764_s0 + $0x4c] sm:$0xff]   ;;  %v243_v21 = vsel %vm118_vm1, %v1292_v18, 0  ;;  %v1293_v22 = vld [vmem:[%s1764_s0 + $0x40] sm:$0xff]   ;;  %v1301_v28 = vld [vmem:[%s1764_s0 + $0x114] sm:$0xff]  }
   0x8   :  { %249 = vmatprep.subr.bf16.mxu1 %v1358_v0  ;;  %1090 = vmatprep.mubr.msk.bf16.mxu1 %vm114_vm0, %v1431_v13  ;;  %v1294_v23 = vld [vmem:[%s1764_s0 + $0x8c] sm:$0xff]   ;;  %v1474_v24 = vld [vmem:[%s1765_s1] ss:$8 sps:$4 sm:$0xff]   ;;  %v1304_v31 = vld [vmem:[%s1764_s0 + $0xb8] sm:$0xff]  }
   0x9   :  { %v1298_v25 = vld [vmem:[%s1764_s0 + $0xd0] sm:$0xff]   ;;  %v1299_v26 = vld [vmem:[%s1764_s0 + $0x11c] sm:$0xff]   ;;  %v1300_v27 = vld [vmem:[%s1764_s0 + $0xc8] sm:$0xff]  }
   0xa   :  { %127 = vmatpush1.bf16.msra.mxu0 %v1279_v5  ;;  %v1302_v29 = vld [vmem:[%s1764_s0 + $0xc0] sm:$0xff]   ;;  %v1303_v30 = vld [vmem:[%s1764_s0 + $0x10c] sm:$0xff]   ;;  %v1309_v38 = vld [vmem:[%s1764_s0 + $0xf4] sm:$0xff]  }
   0xb   :  { %250 = vmatpush1.bf16.msra.mxu1 %v1280_v6  ;;  %128 = vmatprep.subr.bf16.mxu0 %v1358_v0  ;;  %v1305_v32 = vld [vmem:[%s1764_s0 + $0x104] sm:$0xff]   ;;  %v1306_v33 = vld [vmem:[%s1764_s0 + $0xb0] sm:$0xff]   ;;  %v1307_v35 = vld [vmem:[%s1764_s0 + $0xfc] sm:$0xff]  }
   0xc   :  { %251 = vmatprep.subr.bf16.mxu1 %v1358_v0  ;;  %v17_v34 = vld [vmem:[%s1766_s2] sm:$0xff]  ;;  %v18_v36 = vld [vmem:[%s1766_s2 + $0x8] sm:$0xff]  ;;  %v1312_v42 = vld [vmem:[%s1764_s0 + $0x98] sm:$0xff]  }
   0xd   :  { %40 = vperm.xlu0 %1274, %v17_v34   ;;  %v1308_v37 = vld [vmem:[%s1764_s0 + $0xa8] sm:$0xff]   ;;  %v1310_v39 = vld [vmem:[%s1764_s0 + $0xa0] sm:$0xff]   ;;  %v1316_v47 = vld [vmem:[%s1764_s0 + $0xd8] sm:$0xff]  }
   0xe   :  { %129 = vmatpush1.bf16.msra.mxu0 %v1281_v7  ;;  %v1311_v40 = vld [vmem:[%s1764_s0 + $0xec] sm:$0xff]   ;;  %v1314_v41 = vld [vmem:[%s1764_s0 + $0xe0] ss:$0 sps:$4 sm:$0x77]   ;;  %v1313_v44 = vld [vmem:[%s1764_s0 + $0xe4] sm:$0xff]  }
   0xf   :  { %252 = vmatpush1.bf16.msra.mxu1 %v1282_v8  ;;  %130 = vmatprep.subr.bf16.mxu0 %v1358_v0  ;;  %v1315_v43 = vld [vmem:[%s1764_s0 + $0x12c] ss:$0 sps:$4 sm:$0x77]   ;;  %v368_v45 = vsel %vm118_vm1, %v1314_v41, 0  ;;  %v1317_v48 = vld [vmem:[%s1764_s0 + $0x124] sm:$0xff]   ;;  %v1319_v50 = vld [vmem:[%s1764_s0 + $0x1b4] sm:$0xff]  }
  0x10   :  { %253 = vmatprep.subr.bf16.mxu1 %v1358_v0  ;;  %v493_v46 = vsel %vm118_vm1, %v1315_v43, 0  ;;  %v1318_v49 = vld [vmem:[%s1764_s0 + $0x168] sm:$0xff]   ;;  %v1320_v51 = vld [vmem:[%s1764_s0 + $0x160] sm:$0xff]   ;;  %v1322_v53 = vld [vmem:[%s1764_s0 + $0x158] sm:$0xff]  }
  0x11   :  { %45 = vperm.xlu0 %1274, %v18_v36   ;;  %v1321_v52 = vld [vmem:[%s1764_s0 + $0x1ac] sm:$0xff]   ;;  %v1323_v54 = vld [vmem:[%s1764_s0 + $0x1a4] sm:$0xff]   ;;  %v1325_v56 = vld [vmem:[%s1764_s0 + $0x19c] sm:$0xff]  }
  0x12   :  { %131 = vmatpush1.bf16.msra.mxu0 %v1283_v9  ;;  %v1324_v55 = vld [vmem:[%s1764_s0 + $0x150] sm:$0xff]   ;;  %v1326_v57 = vld [vmem:[%s1764_s0 + $0x148] sm:$0xff]   ;;  %v1328_v59 = vld [vmem:[%s1764_s0 + $0x140] sm:$0xff]  }
  0x13   :  { %254 = vmatpush1.bf16.msra.mxu1 %v1284_v10  ;;  %132 = vmatprep.subr.bf16.mxu0 %v1358_v0  ;;  %v1327_v58 = vld [vmem:[%s1764_s0 + $0x194] sm:$0xff]   ;;  %v1329_v60 = vld [vmem:[%s1764_s0 + $0x18c] sm:$0xff]   ;;  %v1331_v62 = vld [vmem:[%s1764_s0 + $0x184] sm:$0xff]  }
  0x14   :  { %255 = vmatprep.subr.bf16.mxu1 %v1358_v0  ;;  %v1330_v61 = vld [vmem:[%s1764_s0 + $0x138] sm:$0xff]   ;;  %v1332_v63 = vld [vmem:[%s1764_s0 + $0x130] sm:$0xff]   ;;  %v1335_v3 = vld [vmem:[%s1764_s0 + $0x1c4] ss:$0 sps:$4 sm:$0x77]  }
  0x15   :  { %v1333_v1 = vld [vmem:[%s1764_s0 + $0x17c] sm:$0xff]   ;;  %v1334_v2 = vld [vmem:[%s1764_s0 + $0x178] ss:$0 sps:$4 sm:$0x77]   ;;  %v744_v5 = vsel %vm118_vm1, %v1335_v3, 0  ;;  %v1336_v6 = vld [vmem:[%s1764_s0 + $0x170] sm:$0xff]  }
  0x16   :  { %133 = vmatpush1.bf16.msra.mxu0 %v1285_v11  ;;  %v621_v4 = vsel %vm118_vm1, %v1334_v2, 0  ;;  %v1337_v7 = vld [vmem:[%s1764_s0 + $0x1bc] sm:$0xff]   ;;  %v1339_v9 = vld [vmem:[%s1764_s0 + $0x24c] sm:$0xff]   ;;  %v1341_v11 = vld [vmem:[%s1764_s0 + $0x244] sm:$0xff]  }
  0x17   :  { %256 = vmatpush1.bf16.msra.mxu1 %v1286_v12  ;;  %134 = vmatprep.subr.bf16.mxu0 %v1358_v0  ;;  %v1338_v8 = vld [vmem:[%s1764_s0 + $0x200] sm:$0xff]   ;;  %v1340_v10 = vld [vmem:[%s1764_s0 + $0x1f8] sm:$0xff]   ;;  %v1342_v12 = vld [vmem:[%s1764_s0 + $0x1f0] sm:$0xff]  }
  0x18   :  { %257 = vmatprep.subr.bf16.mxu1 %v1358_v0  ;;  %v1346_v16 = vld [vmem:[%s1764_s0 + $0x1e0] sm:$0xff]   ;;  %v1348_v18 = vld [vmem:[%s1764_s0 + $0x1d8] sm:$0xff]  }
  0x1a   :  { %135 = vmatpush1.bf16.msra.mxu0 %v1287_v14  ;;  %v1343_v14 = vld [vmem:[%s1764_s0 + $0x23c] sm:$0xff]  }
  0x1b   :  { %258 = vmatpush1.bf16.msra.mxu1 %v1288_v15  ;;  %136 = vmatprep.subr.bf16.mxu0 %v1358_v0  ;;  %v1344_v15 = vld [vmem:[%s1764_s0 + $0x1e8] sm:$0xff]  }
  0x1c   :  { %259 = vmatprep.subr.bf16.mxu1 %v1358_v0 }
  0x1e   :  { %137 = vmatpush1.bf16.msra.mxu0 %v1289_v17  ;;  %v1347_v17 = vld [vmem:[%s1764_s0 + $0x22c] sm:$0xff]  }
  0x1f   :  { %260 = vmatpush1.bf16.msra.mxu1 %v1290_v19  ;;  %150 = vmatprep.subr.bf16.mxu0 %v1358_v0  ;;  %v1349_v19 = vld [vmem:[%s1764_s0 + $0x224] sm:$0xff]  }
  0x20   :  { %273 = vmatprep.subr.bf16.mxu1 %v1358_v0 }
  0x22   :  { %151 = vmatpush2.bf16.msra.mxu0 %v120_v20  ;;  %v1350_v20 = vld [vmem:[%s1764_s0 + $0x1d0] sm:$0xff]  }
  0x23   :  { %274 = vmatpush2.bf16.msra.mxu1 %v243_v21  ;;  %152 = vmatprep.subr.bf16.mxu0 %v1358_v0  ;;  %v1351_v21 = vld [vmem:[%s1764_s0 + $0x21c] sm:$0xff]  }
  0x24   :  { %275 = vmatprep.subr.bf16.mxu1 %v1358_v0 }
  0x26   :  { %153 = vmatpush2.bf16.msra.mxu0 %v1293_v22  ;;  %v1352_v22 = vld [vmem:[%s1764_s0 + $0x1c8] sm:$0xff]  }
  0x27   :  { %276 = vmatpush2.bf16.msra.mxu1 %v1294_v23  ;;  %370 = vmatprep.subr.bf16.mxu0 %v1358_v0  ;;  %v1353_v23 = vld [vmem:[%s1764_s0 + $0x214] sm:$0xff]  }
  0x28   :  { %495 = vmatprep.subr.bf16.mxu1 %v1358_v0 }
  0x29   :  { %155 = vmatmul.mubr.bf16.vlgmr.msra.gmra.mxu0 %v1474_v24 }
  0x2a   :  { %278 = vmatmul.mubr.bf16.vlgmr.msra.gmra.mxu1 %v1474_v24  ;;  %371 = vmatpush1.bf16.msra.mxu0 %v1298_v25  ;;  %v1354_v25 = vld [vmem:[%s1764_s0 + $0x210] ss:$0 sps:$4 sm:$0x77]  }
  0x2b   :  { %496 = vmatpush1.bf16.msra.mxu1 %v1299_v26  ;;  %372 = vmatprep.subr.bf16.mxu0 %v1358_v0  ;;  %v1355_v26 = vld [vmem:[%s1764_s0 + $0x25c] ss:$0 sps:$4 sm:$0x77]  }
  0x2c   :  { %497 = vmatprep.subr.bf16.mxu1 %v1358_v0  ;;  %1120 = vmatprep.mubr.msk.bf16.mxu0 %vm114_vm0, %v1431_v13 }
  0x2d   :  { %1150 = vmatprep.mubr.msk.bf16.mxu1 %vm114_vm0, %v1431_v13 }
  0x2e   :  { %373 = vmatpush1.bf16.msra.mxu0 %v1300_v27  ;;  %v869_v27 = vsel %vm118_vm1, %v1354_v25, 0 }
  0x2f   :  { %498 = vmatpush1.bf16.msra.mxu1 %v1301_v28  ;;  %374 = vmatprep.subr.bf16.mxu0 %v1358_v0  ;;  %v994_v28 = vsel %vm118_vm1, %v1355_v26, 0 }
  0x30   :  { %499 = vmatprep.subr.bf16.mxu1 %v1358_v0 }
  0x32   :  { %375 = vmatpush1.bf16.msra.mxu0 %v1302_v29  ;;  %v1356_v29 = vld [vmem:[%s1764_s0 + $0x208] sm:$0xff]  }
  0x33   :  { %500 = vmatpush1.bf16.msra.mxu1 %v1303_v30  ;;  %376 = vmatprep.subr.bf16.mxu0 %v1358_v0  ;;  %v1357_v30 = vld [vmem:[%s1764_s0 + $0x254] sm:$0xff]  }
  0x34   :  { %501 = vmatprep.subr.bf16.mxu1 %v1358_v0 }
  0x36   :  { %377 = vmatpush1.bf16.msra.mxu0 %v1304_v31 }
  0x37   :  { %502 = vmatpush1.bf16.msra.mxu1 %v1305_v32  ;;  %378 = vmatprep.subr.bf16.mxu0 %v1358_v0 }
  0x38   :  { %503 = vmatprep.subr.bf16.mxu1 %v1358_v0 }
  0x3a   :  { %379 = vmatpush1.bf16.msra.mxu0 %v1306_v33 }
  0x3b   :  { %504 = vmatpush1.bf16.msra.mxu1 %v1307_v35  ;;  %380 = vmatprep.subr.bf16.mxu0 %v1358_v0 }
  0x3c   :  { %505 = vmatprep.subr.bf16.mxu1 %v1358_v0 }
  0x3e   :  { %381 = vmatpush1.bf16.msra.mxu0 %v1308_v37 }
  0x3f   :  { %506 = vmatpush1.bf16.msra.mxu1 %v1309_v38  ;;  %382 = vmatprep.subr.bf16.mxu0 %v1358_v0 }
  0x40   :  { %507 = vmatprep.subr.bf16.mxu1 %v1358_v0 }
  0x42   :  { %383 = vmatpush1.bf16.msra.mxu0 %v1310_v39 }
  0x43   :  { %508 = vmatpush1.bf16.msra.mxu1 %v1311_v40  ;;  %384 = vmatprep.subr.bf16.mxu0 %v1358_v0 }
  0x44   :  { %509 = vmatprep.subr.bf16.mxu1 %v1358_v0 }
  0x46   :  { %385 = vmatpush1.bf16.msra.mxu0 %v1312_v42 }
  0x47   :  { %510 = vmatpush1.bf16.msra.mxu1 %v1313_v44  ;;  %398 = vmatprep.subr.bf16.mxu0 %v1358_v0 }
  0x48   :  { %523 = vmatprep.subr.bf16.mxu1 %v1358_v0 }
  0x4a   :  { %399 = vmatpush2.bf16.msra.mxu0 %v368_v45 }
  0x4b   :  { %524 = vmatpush2.bf16.msra.mxu1 %v493_v46  ;;  %400 = vmatprep.subr.bf16.mxu0 %v1358_v0 }
  0x4c   :  { %525 = vmatprep.subr.bf16.mxu1 %v1358_v0 }
  0x4e   :  { %401 = vmatpush2.bf16.msra.mxu0 %v1316_v47 }
  0x4f   :  { %526 = vmatpush2.bf16.msra.mxu1 %v1317_v48  ;;  %623 = vmatprep.subr.bf16.mxu0 %v1358_v0 }
  0x50   :  { %746 = vmatprep.subr.bf16.mxu1 %v1358_v0 }
  0x51   :  { %403 = vmatmul.mubr.bf16.vlgmr.msra.gmra.mxu0 %v1474_v24 }
  0x52   :  { %528 = vmatmul.mubr.bf16.vlgmr.msra.gmra.mxu1 %v1474_v24  ;;  %624 = vmatpush1.bf16.msra.mxu0 %v1318_v49 }
  0x53   :  { %747 = vmatpush1.bf16.msra.mxu1 %v1319_v50  ;;  %625 = vmatprep.subr.bf16.mxu0 %v1358_v0 }
  0x54   :  { %748 = vmatprep.subr.bf16.mxu1 %v1358_v0  ;;  %1180 = vmatprep.mubr.msk.bf16.mxu0 %vm114_vm0, %v1431_v13 }
  0x55   :  { %1210 = vmatprep.mubr.msk.bf16.mxu1 %vm114_vm0, %v1431_v13 }
  0x56   :  { %626 = vmatpush1.bf16.msra.mxu0 %v1320_v51 }
  0x57   :  { %749 = vmatpush1.bf16.msra.mxu1 %v1321_v52  ;;  %627 = vmatprep.subr.bf16.mxu0 %v1358_v0 }
  0x58   :  { %750 = vmatprep.subr.bf16.mxu1 %v1358_v0 }
  0x5a   :  { %628 = vmatpush1.bf16.msra.mxu0 %v1322_v53 }
  0x5b   :  { %751 = vmatpush1.bf16.msra.mxu1 %v1323_v54  ;;  %629 = vmatprep.subr.bf16.mxu0 %v1358_v0 }
  0x5c   :  { %752 = vmatprep.subr.bf16.mxu1 %v1358_v0 }
  0x5e   :  { %630 = vmatpush1.bf16.msra.mxu0 %v1324_v55 }
  0x5f   :  { %753 = vmatpush1.bf16.msra.mxu1 %v1325_v56  ;;  %631 = vmatprep.subr.bf16.mxu0 %v1358_v0 }
  0x60   :  { %754 = vmatprep.subr.bf16.mxu1 %v1358_v0 }
  0x62   :  { %632 = vmatpush1.bf16.msra.mxu0 %v1326_v57 }
  0x63   :  { %755 = vmatpush1.bf16.msra.mxu1 %v1327_v58  ;;  %633 = vmatprep.subr.bf16.mxu0 %v1358_v0 }
  0x64   :  { %756 = vmatprep.subr.bf16.mxu1 %v1358_v0 }
  0x66   :  { %634 = vmatpush1.bf16.msra.mxu0 %v1328_v59 }
  0x67   :  { %757 = vmatpush1.bf16.msra.mxu1 %v1329_v60  ;;  %635 = vmatprep.subr.bf16.mxu0 %v1358_v0 }
  0x68   :  { %758 = vmatprep.subr.bf16.mxu1 %v1358_v0 }
  0x6a   :  { %636 = vmatpush1.bf16.msra.mxu0 %v1330_v61 }
  0x6b   :  { %759 = vmatpush1.bf16.msra.mxu1 %v1331_v62  ;;  %637 = vmatprep.subr.bf16.mxu0 %v1358_v0 }
  0x6c   :  { %760 = vmatprep.subr.bf16.mxu1 %v1358_v0 }
  0x6e   :  { %638 = vmatpush1.bf16.msra.mxu0 %v1332_v63 }
  0x6f   :  { %761 = vmatpush1.bf16.msra.mxu1 %v1333_v1  ;;  %651 = vmatprep.subr.bf16.mxu0 %v1358_v0 }
  0x70   :  { %774 = vmatprep.subr.bf16.mxu1 %v1358_v0 }
  0x72   :  { %652 = vmatpush2.bf16.msra.mxu0 %v621_v4 }
  0x73   :  { %775 = vmatpush2.bf16.msra.mxu1 %v744_v5  ;;  %653 = vmatprep.subr.bf16.mxu0 %v1358_v0 }
  0x74   :  { %776 = vmatprep.subr.bf16.mxu1 %v1358_v0 }
  0x76   :  { %654 = vmatpush2.bf16.msra.mxu0 %v1336_v6 }
  0x77   :  { %777 = vmatpush2.bf16.msra.mxu1 %v1337_v7  ;;  %871 = vmatprep.subr.bf16.mxu0 %v1358_v0 }
  0x78   :  { %996 = vmatprep.subr.bf16.mxu1 %v1358_v0 }
  0x79   :  { %656 = vmatmul.mubr.bf16.vlgmr.msra.gmra.mxu0 %v1474_v24 }
  0x7a   :  { %779 = vmatmul.mubr.bf16.vlgmr.msra.gmra.mxu1 %v1474_v24  ;;  %872 = vmatpush1.bf16.msra.mxu0 %v1338_v8 }
  0x7b   :  { %997 = vmatpush1.bf16.msra.mxu1 %v1339_v9  ;;  %873 = vmatprep.subr.bf16.mxu0 %v1358_v0 }
  0x7c   :  { %998 = vmatprep.subr.bf16.mxu1 %v1358_v0  ;;  %1240 = vmatprep.mubr.msk.bf16.mxu0 %vm114_vm0, %v1431_v13 }
  0x7d   :  { %1270 = vmatprep.mubr.msk.bf16.mxu1 %vm114_vm0, %v1431_v13  ;;  %v1345_v13 = vld [vmem:[%s1764_s0 + $0x234] sm:$0xff]  }
  0x7e   :  { %874 = vmatpush1.bf16.msra.mxu0 %v1340_v10 }
  0x7f   :  { %999 = vmatpush1.bf16.msra.mxu1 %v1341_v11  ;;  %875 = vmatprep.subr.bf16.mxu0 %v1358_v0 }
  0x80   :  { %1000 = vmatprep.subr.bf16.mxu1 %v1358_v0 }
  0x82   :  { %876 = vmatpush1.bf16.msra.mxu0 %v1342_v12 }
  0x83   :  { %1001 = vmatpush1.bf16.msra.mxu1 %v1343_v14  ;;  %877 = vmatprep.subr.bf16.mxu0 %v1358_v0 }
  0x84   :  { %1002 = vmatprep.subr.bf16.mxu1 %v1358_v0 }
  0x86   :  { %878 = vmatpush1.bf16.msra.mxu0 %v1344_v15 }
  0x87   :  { %1003 = vmatpush1.bf16.msra.mxu1 %v1345_v13  ;;  %879 = vmatprep.subr.bf16.mxu0 %v1358_v0 }
  0x88   :  { %1004 = vmatprep.subr.bf16.mxu1 %v1358_v0  ;;  %v41_v39 = vpop.permute.xlu0 %40 }
  0x8a   :  { %880 = vmatpush1.bf16.msra.mxu0 %v1346_v16 }
  0x8b   :  { %1005 = vmatpush1.bf16.msra.mxu1 %v1347_v17  ;;  %881 = vmatprep.subr.bf16.mxu0 %v1358_v0 }
  0x8c   :  { %1006 = vmatprep.subr.bf16.mxu1 %v1358_v0  ;;  %v46_v42 = vpop.permute.xlu0 %45 }
  0x8e   :  { %882 = vmatpush1.bf16.msra.mxu0 %v1348_v18 }
  0x8f   :  { %1007 = vmatpush1.bf16.msra.mxu1 %v1349_v19  ;;  %883 = vmatprep.subr.bf16.mxu0 %v1358_v0 }
  0x90   :  { %1008 = vmatprep.subr.bf16.mxu1 %v1358_v0 }
  0x92   :  { %884 = vmatpush1.bf16.msra.mxu0 %v1350_v20 }
  0x93   :  { %1009 = vmatpush1.bf16.msra.mxu1 %v1351_v21  ;;  %885 = vmatprep.subr.bf16.mxu0 %v1358_v0 }
  0x94   :  { %1010 = vmatprep.subr.bf16.mxu1 %v1358_v0 }
  0x96   :  { %886 = vmatpush1.bf16.msra.mxu0 %v1352_v22 }
  0x97   :  { %1011 = vmatpush1.bf16.msra.mxu1 %v1353_v23  ;;  %899 = vmatprep.subr.bf16.mxu0 %v1358_v0 }
  0x98   :  { %1024 = vmatprep.subr.bf16.mxu1 %v1358_v0 }
  0x9a   :  { %900 = vmatpush2.bf16.msra.mxu0 %v869_v27 }
  0x9b   :  { %1025 = vmatpush2.bf16.msra.mxu1 %v994_v28  ;;  %901 = vmatprep.subr.bf16.mxu0 %v1358_v0 }
  0x9c   :  { %1026 = vmatprep.subr.bf16.mxu1 %v1358_v0 }
  0x9e   :  { %902 = vmatpush2.bf16.msra.mxu0 %v1356_v29 }
  0x9f   :  { %1027 = vmatpush2.bf16.msra.mxu1 %v1357_v30 }
  0xa1   :  { %904 = vmatmul.mubr.bf16.vlgmr.msra.gmra.mxu0 %v1474_v24 }
  0xa2   :  { %1029 = vmatmul.mubr.bf16.vlgmr.msra.gmra.mxu1 %v1474_v24 }
  0xe9   :  { %v156_v31 = vpop.f32.mrf.mxu0 }
  0xea   :  { %v279_v32 = vpop.f32.mrf.mxu1  ;;  %v157_v40 = vadd.f32 %v156_v31, %v41_v39 }
  0xeb   :  { %v158_v33 = vpop.f32.mrf.mxu0  ;;  %v280_v41 = vadd.f32 %v279_v32, %v41_v39 }
  0xec   :  { %v281_v34 = vpop.f32.mrf.mxu1  ;;  %v163_v43 = vmax.f32 %v157_v40, 0.0 }
  0xed   :  { %v159_v35 = vpop.f32.mrf.mxu0  ;;  %v286_v0 = vmax.f32 %v280_v41, 0.0 }
  0xee   :  { %v282_v36 = vpop.f32.mrf.mxu1  ;;  %v160_v44 = vadd.f32 %v159_v35, %v46_v42 }
  0xef   :  { %v161_v37 = vpop.f32.mrf.mxu0  ;;  %v283_v45 = vadd.f32 %v282_v36, %v46_v42  ;;  %v288_v50 = vmax.f32 %v163_v43, %v286_v0 }
  0xf0   :  { %v284_v38 = vpop.f32.mrf.mxu1  ;;  %v164_v51 = vmax.f32 %v160_v44, 0.0 }
  0xf1   :  { %v287_v52 = vmax.f32 %v283_v45, 0.0 }
  0xf3   :  { %v289_v62 = vmax.f32 %v164_v51, %v287_v52 }
 0x111   :  { %v404_v46 = vpop.f32.mrf.mxu0 }
 0x112   :  { %v405_v47 = vadd.f32 %v404_v46, %v41_v39  ;;  %v529_v48 = vpop.f32.mrf.mxu1 }
 0x113   :  { %v530_v24 = vadd.f32 %v529_v48, %v41_v39  ;;  %v406_v49 = vpop.f32.mrf.mxu0 }
 0x114   :  { %v411_v53 = vmax.f32 %v405_v47, 0.0  ;;  %v531_v54 = vpop.f32.mrf.mxu1 }
 0x115   :  { %v536_v55 = vmax.f32 %v530_v24, 0.0  ;;  %v407_v56 = vpop.f32.mrf.mxu0 }
 0x116   :  { %v413_v57 = vmax.f32 %v288_v50, %v411_v53  ;;  %v408_v58 = vadd.f32 %v407_v56, %v46_v42  ;;  %v532_v59 = vpop.f32.mrf.mxu1 }
 0x117   :  { %v533_v60 = vadd.f32 %v532_v59, %v46_v42  ;;  %v409_v61 = vpop.f32.mrf.mxu0 }
 0x118   :  { %v538_v63 = vmax.f32 %v413_v57, %v536_v55  ;;  %v412_v1 = vmax.f32 %v408_v58, 0.0  ;;  %v534_v2 = vpop.f32.mrf.mxu1 }
 0x119   :  { %v537_v4 = vmax.f32 %v533_v60, 0.0 }
 0x11a   :  { %541 = vst.msk [vmem:[%s1767_s3] sm:$0xff] %vm540_vm2, %v538_v63  ;;  %v414_v3 = vmax.f32 %v289_v62, %v412_v1 }
 0x11c   :  { %v539_v5 = vmax.f32 %v414_v3, %v537_v4 }
 0x11e   :  { %542 = vst.msk [vmem:[%s1767_s3 + $0x8] sm:$0xff] %vm540_vm2, %v539_v5 }
 0x139   :  { %v657_v6 = vpop.f32.mrf.mxu0 }
 0x13a   :  { %v780_v7 = vpop.f32.mrf.mxu1  ;;  %v658_v15 = vadd.f32 %v657_v6, %v41_v39 }
 0x13b   :  { %v659_v8 = vpop.f32.mrf.mxu0  ;;  %v781_v13 = vadd.f32 %v780_v7, %v41_v39 }
 0x13c   :  { %v782_v9 = vpop.f32.mrf.mxu1  ;;  %v664_v16 = vmax.f32 %v658_v15, 0.0 }
 0x13d   :  { %v660_v10 = vpop.f32.mrf.mxu0  ;;  %v787_v17 = vmax.f32 %v781_v13, 0.0 }
 0x13e   :  { %v783_v11 = vpop.f32.mrf.mxu1  ;;  %v661_v18 = vadd.f32 %v660_v10, %v46_v42 }
 0x13f   :  { %v662_v12 = vpop.f32.mrf.mxu0  ;;  %v784_v19 = vadd.f32 %v783_v11, %v46_v42  ;;  %v789_v26 = vmax.f32 %v664_v16, %v787_v17 }
 0x140   :  { %v785_v14 = vpop.f32.mrf.mxu1  ;;  %v665_v27 = vmax.f32 %v661_v18, 0.0 }
 0x141   :  { %v788_v28 = vmax.f32 %v784_v19, 0.0 }
 0x143   :  { %v790_v38 = vmax.f32 %v665_v27, %v788_v28 }
 0x161   :  { %v905_v20 = vpop.f32.mrf.mxu0 }
 0x162   :  { %v906_v21 = vadd.f32 %v905_v20, %v41_v39  ;;  %v1030_v22 = vpop.f32.mrf.mxu1 }
 0x163   :  { %v1031_v23 = vadd.f32 %v1030_v22, %v41_v39  ;;  %v907_v25 = vpop.f32.mrf.mxu0 }
 0x164   :  { %v912_v29 = vmax.f32 %v906_v21, 0.0  ;;  %v1032_v30 = vpop.f32.mrf.mxu1 }
 0x165   :  { %v908_v31 = vpop.f32.mrf.mxu0  ;;  %v1037_v33 = vmax.f32 %v1031_v23, 0.0 }
 0x166   :  { %v914_v32 = vmax.f32 %v789_v26, %v912_v29  ;;  %v909_v34 = vadd.f32 %v908_v31, %v46_v42  ;;  %v1033_v35 = vpop.f32.mrf.mxu1 }
 0x167   :  { %v1034_v36 = vadd.f32 %v1033_v35, %v46_v42  ;;  %v910_v37 = vpop.f32.mrf.mxu0 }
 0x168   :  { %v1039_v40 = vmax.f32 %v914_v32, %v1037_v33  ;;  %v913_v41 = vmax.f32 %v909_v34, 0.0  ;;  %v1035_v43 = vpop.f32.mrf.mxu1 }
 0x169   :  { %v1038_v0 = vmax.f32 %v1034_v36, 0.0 }
 0x16a   :  { %1271 = vst.msk [vmem:[%s1767_s3 + $0x10] sm:$0xff] %vm540_vm2, %v1039_v40  ;;  %v915_v39 = vmax.f32 %v790_v38, %v913_v41 }
 0x16c   :  { %v1040_v44 = vmax.f32 %v915_v39, %v1038_v0 }
 0x16e   :  { %1272 = vst.msk [vmem:[%s1767_s3 + $0x18] sm:$0xff] %vm540_vm2, %v1040_v44 }

// kernel: lenet5_forward.5
= control target key start
LH: loop header
LB: loop body
LE: loop exit
PB: predicated region body
PF: predicated region fallthrough
CT: control target
= control target key end

     0   :  { %v784_v1 = vmov 0   ;;  %v98_v20 = vlaneseq  ;;  %v785_v25 = vmov 1966171168   ;;  %vm264_vm0 = vcmask 130048   ;;  %s994_s0 = inlined_call_operand.vmem [shape: bf16[2,400], index: 0, kind: input, shape index: {}]   ;;  %s995_s1 = inlined_call_operand.vmem [shape: bf16[400,128], index: 1, kind: input, shape index: {}]   ;;  %s996_s2 = inlined_call_operand.vmem [shape: f32[1,128], index: 2, kind: input, shape index: {}]   ;;  %s997_s3 = inlined_call_operand.vmem [shape: bf16[128,128], index: 3, kind: input, shape index: {}]   ;;  %s998_s4 = inlined_call_operand.vmem [shape: f32[1,128], index: 4, kind: input, shape index: {}]   ;;  %s999_s5 = inlined_call_operand.vmem [shape: bf16[128,10], index: 5, kind: input, shape index: {}]   ;;  %s1000_s6 = inlined_call_operand.vmem [shape: f32[1,10], index: 6, kind: input, shape index: {}]   ;;  %s1001_s7 = inlined_call_operand.hbm [shape: f32[2,10], index: 7, kind: output, shape index: {}]  }
   0x1   :  { %v721_v0 = vld [vmem:[%s995_s1 + $0x78] sm:$0xff]   ;;  %308 = vmatprep.subr.bf16.mxu1 %v784_v1  ;;  %v724_v4 = vld [vmem:[%s995_s1 + $0x70] sm:$0xff]   ;;  %v727_v7 = vld [vmem:[%s995_s1 + $0x68] sm:$0xff]   ;;  %v96_v26 = vunpack.c.l.s4 %v785_v25  ;;  %v786_v38 = vmov 0.0  }
   0x2   :  { %v722_v2 = vld [vmem:[%s995_s1 + $0xb8] sm:$0xff]   ;;  %636 = vmatprep.subr.bf16.mxu0 %v721_v0  ;;  %v725_v5 = vld [vmem:[%s995_s1 + $0xb0] sm:$0xff]   ;;  %v728_v8 = vld [vmem:[%s995_s1 + $0xa8] sm:$0xff]   ;;  %v99_v27 = vshrl.u32 %v98_v20, 7 }
   0x3   :  { %v723_v3 = vld [vmem:[%s995_s1 + $0x38] sm:$0xff]   ;;  %309 = vmatpush1.bf16.msra.mxu1 %v722_v2  ;;  %v726_v6 = vld [vmem:[%s995_s1 + $0x30] sm:$0xff]   ;;  %v729_v9 = vld [vmem:[%s995_s1 + $0x28] sm:$0xff]   ;;  %v97_v30 = vunpack.c.0.s8 %v96_v26 }
   0x4   :  { %637 = vmatpush3.bf16.msra.mxu0 %v723_v3  ;;  %310 = vmatprep.subr.bf16.mxu1 %v784_v1  ;;  %v730_v10 = vld [vmem:[%s995_s1 + $0x60] sm:$0xff]   ;;  %v733_v13 = vld [vmem:[%s995_s1 + $0x58] sm:$0xff]   ;;  %v736_v16 = vld [vmem:[%s995_s1 + $0x50] sm:$0xff]  }
   0x5   :  { %638 = vmatprep.subr.bf16.mxu0 %v724_v4  ;;  %v731_v11 = vld [vmem:[%s995_s1 + $0xa0] sm:$0xff]   ;;  %v734_v14 = vld [vmem:[%s995_s1 + $0x98] sm:$0xff]   ;;  %v737_v17 = vld [vmem:[%s995_s1 + $0x90] sm:$0xff]   ;;  %v100_v32 = vsub.s32 %v97_v30, %v99_v27 }
   0x6   :  { %v732_v12 = vld [vmem:[%s995_s1 + $0x20] sm:$0xff]   ;;  %v735_v15 = vld [vmem:[%s995_s1 + $0x18] sm:$0xff]   ;;  %v738_v18 = vld [vmem:[%s995_s1 + $0x10] sm:$0xff]  }
   0x7   :  { %311 = vmatpush1.bf16.msra.mxu1 %v725_v5  ;;  %v739_v19 = vld [vmem:[%s995_s1 + $0x48] sm:$0xff]   ;;  %v591_v23 = vld.sshfl [vmem:[%s994_s0] sm:$0x33 pattern:$0x75316420]  ;;  %v746_v34 = vld [vmem:[%s997_s3 + $0x38] sm:$0xff]  }
   0x8   :  { %639 = vmatpush3.bf16.msra.mxu0 %v726_v6  ;;  %312 = vmatprep.subr.bf16.mxu1 %v784_v1  ;;  %v740_v21 = vld [vmem:[%s995_s1 + $0x88] sm:$0xff]   ;;  %v742_v24 = vld [vmem:[%s995_s1 + $0x40] sm:$0xff]   ;;  %v94_v29 = vcombine.high %v591_v23, %v591_v23  ;;  %v101_v36 = vrot.slane %v591_v23, %v100_v32  ;;  %v747_v40 = vld [vmem:[%s997_s3 + $0x30] sm:$0xff]  }
   0x9   :  { %640 = vmatprep.subr.bf16.mxu0 %v727_v7  ;;  %v741_v22 = vld [vmem:[%s995_s1 + $0x8] sm:$0xff]   ;;  %v743_v28 = vld [vmem:[%s995_s1 + $0x80] sm:$0xff]  }
   0xa   :  { %v744_v31 = vld [vmem:[%s995_s1] sm:$0xff]   ;;  %v108_v35 = vrot.slane %v94_v29, %v100_v32  ;;  %v109_v39 = vcombine.high %v101_v36, %v101_v36 }
   0xb   :  { %313 = vmatpush1.bf16.msra.mxu1 %v728_v8  ;;  %v745_v33 = vld [vmem:[%s995_s1 + $0xc0] sm:$0xff]  }
   0xc   :  { %641 = vmatpush3.bf16.msra.mxu0 %v729_v9  ;;  %314 = vmatprep.subr.bf16.mxu1 %v784_v1  ;;  %v110_v37 = vcombine.high %v108_v35, %v108_v35 }
   0xd   :  { %642 = vmatprep.subr.bf16.mxu0 %v730_v10  ;;  %300 = vmatprep.mubr.bf16.mxu0 %v108_v35 }
   0xe   :  { %617 = vmatprep.mubr.msk.bf16.mxu1 %vm264_vm0, %v110_v37 }
   0xf   :  { %315 = vmatpush1.bf16.msra.mxu1 %v731_v11 }
  0x10   :  { %643 = vmatpush3.bf16.msra.mxu0 %v732_v12  ;;  %316 = vmatprep.subr.bf16.mxu1 %v784_v1 }
  0x11   :  { %644 = vmatprep.subr.bf16.mxu0 %v733_v13 }
  0x13   :  { %317 = vmatpush1.bf16.msra.mxu1 %v734_v14 }
  0x14   :  { %645 = vmatpush3.bf16.msra.mxu0 %v735_v15  ;;  %318 = vmatprep.subr.bf16.mxu1 %v784_v1 }
  0x15   :  { %646 = vmatprep.subr.bf16.mxu0 %v736_v16 }
  0x17   :  { %319 = vmatpush1.bf16.msra.mxu1 %v737_v17 }
  0x18   :  { %647 = vmatpush3.bf16.msra.mxu0 %v738_v18  ;;  %320 = vmatprep.subr.bf16.mxu1 %v784_v1 }
  0x19   :  { %648 = vmatprep.subr.bf16.mxu0 %v739_v19 }
  0x1b   :  { %321 = vmatpush1.bf16.msra.mxu1 %v740_v21 }
  0x1c   :  { %649 = vmatpush3.bf16.msra.mxu0 %v741_v22  ;;  %322 = vmatprep.subr.bf16.mxu1 %v784_v1 }
  0x1d   :  { %650 = vmatprep.subr.bf16.mxu0 %v742_v24 }
  0x1f   :  { %323 = vmatpush1.bf16.msra.mxu1 %v743_v28 }
  0x20   :  { %651 = vmatpush3.bf16.msra.mxu0 %v744_v31  ;;  %338 = vmatprep.subr.bf16.mxu1 %v784_v1 }
  0x21   :  { %676 = vmatprep.subr.bf16.mxu0 %v786_v38 }
  0x23   :  { %301 = vmatmul.mubr.bf16.vlgmr.msra.gmra.mxu0 %v101_v36  ;;  %339 = vmatpush2.bf16.msra.mxu1 %v745_v33 }
  0x24   :  { %677 = vmatpush3.bf16.msra.mxu0 %v746_v34  ;;  %696 = vmatprep.subr.bf16.mxu1 %v786_v38 }
  0x25   :  { %678 = vmatprep.subr.bf16.mxu0 %v786_v38 }
  0x26   :  { %341 = vmatmul.mubr.bf16.vlgmr.msra.gmra.mxu1 %v109_v39 }
  0x27   :  { %12 = vsyncpa [#allocation3], 0  ;;  %v748_v41 = vld [vmem:[%s997_s3 + $0x28] sm:$0xff]   ;;  %v749_v42 = vld [vmem:[%s997_s3 + $0x20] sm:$0xff]   ;;  %vm787_vm1 = vmmov 0   ;;  %s788_s16 = smov [#allocation2]  }
  0x28   :  { %679 = vmatpush3.bf16.msra.mxu0 %v747_v40  ;;  %v750_v43 = vld [vmem:[%s997_s3 + $0x18] sm:$0xff]   ;;  %v751_v44 = vld [vmem:[%s997_s3 + $0x10] sm:$0xff]   ;;  %v752_v45 = vld [vmem:[%s997_s3 + $0x8] sm:$0xff]   ;;  %692 = vmatprep.mubr.msk.bf16.mxu0 %vm787_vm1, %v786_v38  ;;  %s582_s17 = sshll.u32 %s788_s16, 4  ;;  %vm574_vm2 = vcmask 74752   ;;  %s583_s17 = int_to_ptr.vmem [resolvable:$true] %s582_s17 }
  0x29   :  { %680 = vmatprep.subr.bf16.mxu0 %v786_v38  ;;  %v753_v46 = vld [vmem:[%s997_s3] sm:$0xff]   ;;  %712 = vmatprep.mubr.msk.bf16.mxu1 %vm787_vm1, %v786_v38  ;;  %v754_v47 = vld [vmem:[%s999_s5 + $0x38] sm:$0xff]   ;;  %v755_v48 = vld [vmem:[%s999_s5 + $0x30] sm:$0xff]   ;;  %p767_p1 = scmp.lt.s32.totalorder %s583_s17, %s583_s17 }
  0x2a   :  { %697 = vmatpush3.bf16.msra.mxu1 %v754_v47  ;;  %v756_v49 = vld [vmem:[%s999_s5 + $0x28] sm:$0xff]   ;;  %v757_v50 = vld [vmem:[%s999_s5 + $0x20] sm:$0xff]   ;;  %v758_v51 = vld [vmem:[%s999_s5 + $0x18] sm:$0xff]  }
  0x2b   :  { %698 = vmatprep.subr.bf16.mxu1 %v786_v38  ;;  %v759_v52 = vld [vmem:[%s999_s5 + $0x10] sm:$0xff]   ;;  %v590_v55 = vld [vmem:[%s996_s2] ss:$0 sm:$0xff]  ;;  %v760_v3 = vld [vmem:[%s999_s5 + $0x8] sm:$0xff]  }
  0x2c   :  { %681 = vmatpush3.bf16.msra.mxu0 %v748_v41  ;;  %v761_v4 = vld [vmem:[%s999_s5] sm:$0xff]  }
  0x2d   :  { %682 = vmatprep.subr.bf16.mxu0 %v786_v38  ;;  %v618_v5 = vld [vmem:[%s998_s4] ss:$0 sm:$0xff]  ;;  %s762_s4 = scalar_lea.vmem %s583_s17, 32 }
  0x2e   :  { %699 = vmatpush3.bf16.msra.mxu1 %v755_v48  ;;  %v627_v13 = vld [vmem:[%s1000_s6] ss:$0 sm:$0xff]  ;;  %p763_p0 = scmp.ne.s32.totalorder %s583_s17, %s762_s4  ;;  %p768_p2 = scmp.lt.s32.totalorder %s762_s4, %s762_s4 }
  0x2f   :  { %700 = vmatprep.subr.bf16.mxu1 %v786_v38 }
  0x30   :  { %683 = vmatpush3.bf16.msra.mxu0 %v749_v42  ;;  %p769_p3 = por %p768_p2, %p767_p1 }
  0x31   :  { %684 = vmatprep.subr.bf16.mxu0 %v786_v38 }
  0x32   :  { %701 = vmatpush3.bf16.msra.mxu1 %v756_v49  ;;  %p770_p4 = pnand %p769_p3, %p763_p0 }
  0x33   :  { %702 = vmatprep.subr.bf16.mxu1 %v786_v38 }
  0x34   :  { %685 = vmatpush3.bf16.msra.mxu0 %v750_v43 }
  0x35   :  { %686 = vmatprep.subr.bf16.mxu0 %v786_v38 }
  0x36   :  { %703 = vmatpush3.bf16.msra.mxu1 %v757_v50 }
  0x37   :  { %704 = vmatprep.subr.bf16.mxu1 %v786_v38 }
  0x38   :  { %687 = vmatpush3.bf16.msra.mxu0 %v751_v44 }
  0x39   :  { %688 = vmatprep.subr.bf16.mxu0 %v786_v38 }
  0x3a   :  { %705 = vmatpush3.bf16.msra.mxu1 %v758_v51 }
  0x3b   :  { %706 = vmatprep.subr.bf16.mxu1 %v786_v38 }
  0x3c   :  { %689 = vmatpush3.bf16.msra.mxu0 %v752_v45 }
  0x3d   :  { %690 = vmatprep.subr.bf16.mxu0 %v786_v38 }
  0x3e   :  { %707 = vmatpush3.bf16.msra.mxu1 %v759_v52 }
  0x3f   :  { %708 = vmatprep.subr.bf16.mxu1 %v786_v38 }
  0x40   :  { %691 = vmatpush3.bf16.msra.mxu0 %v753_v46 }
  0x42   :  { %709 = vmatpush3.bf16.msra.mxu1 %v760_v3 }
  0x43   :  { %710 = vmatprep.subr.bf16.mxu1 %v786_v38 }
  0x46   :  { %711 = vmatpush3.bf16.msra.mxu1 %v761_v4 }
  0xe3   :  { %v652_v53 = vpop.f32.mrf.mxu0 }
  0xe5   :  { %v653_v54 = vpop.f32.mrf.mxu0 }
  0xe6   :  { %v654_v56 = vadd.f32 %v653_v54, %v652_v53  ;;  %v342_v57 = vpop.f32.mrf.mxu1 }
  0xe7   :  { %v655_v58 = vpop.f32.mrf.mxu0 }
  0xe8   :  { %v303_v59 = vadd.f32 %v654_v56, %v590_v55  ;;  %v344_v60 = vpop.f32.mrf.mxu1 }
  0xe9   :  { %v656_v61 = vpop.f32.mrf.mxu0 }
  0xea   :  { %v343_v62 = vadd.f32 %v342_v57, %v303_v59  ;;  %v345_v63 = vpop.f32.mrf.mxu1 }
  0xec   :  { %v348_v0 = vmax.f32 %v343_v62, 0.0  ;;  %v346_v1 = vpop.f32.mrf.mxu1 }
  0xee   :  { %v349_v2 = vpack.c.bf16 %v348_v0, %v348_v0 }
  0xf0   :  { %693 = vmatmul.mubr.bf16.vlgmr.msra.gmra.mxu0 %v349_v2 }
 0x1b0   :  { %v455_v6 = vpop.f32.mrf.mxu0 }
 0x1b1   :  { %v456_v7 = vadd.f32 %v618_v5, %v455_v6 }
 0x1b2   :  { %v694_v8 = vpop.f32.mrf.mxu0 }
 0x1b3   :  { %v461_v9 = vmax.f32 %v456_v7, 0.0 }
 0x1b4   :  { %v458_v10 = vpop.f32.mrf.mxu0 }
 0x1b5   :  { %v462_v11 = vpack.c.bf16 %v461_v9, %v461_v9 }
 0x1b6   :  { %v695_v12 = vpop.f32.mrf.mxu0 }
 0x1b7   :  { %713 = vmatmul.mubr.bf16.vlgmr.msra.gmra.mxu1 %v462_v11 }
 0x277   :  { %v568_v14 = vpop.f32.mrf.mxu1 }
 0x278   :  { %v569_v15 = vadd.f32 %v627_v13, %v568_v14 }
 0x279   :  { %v714_v16 = vpop.f32.mrf.mxu1 }
 0x27a   :  { %575 = vst.msk [vmem:[#allocation2] sm:$0x3] %vm574_vm2, %v569_v15 }
 0x27b   :  { %v571_v17 = vpop.f32.mrf.mxu1 }
 0x27c   :  { %773 = shalt.err (!%p770_p4)
}
 0x27d   :  { %585 = dma.vmem_to_hbm [thread:$0]  %s583_s17, 32, %s1001_s7, [#allocation3]   ;;  %v715_v18 = vpop.f32.mrf.mxu1 }
 0x27e   :  { %782 = dma.done.wait [#allocation3], 32  }
 0x27f   :  { %783 = vsyncadd [#allocation3], 4294967264 }
 0x280   :  { %589 = vsyncpa [#allocation3], 1 }

</bundles_post_ra>
